<compile_context>
chip_gen: v6e
topology: v6e:2x2x1
jax: 0.10.0
libtpu: 0.0.40
codegen_flags: <defaults>
</compile_context>

<pallas_src>
import functools
import random

import jax
import jax.numpy as jnp
from jax.experimental import pallas as pl
from jax.experimental.pallas import tpu as pltpu


# ------------------------------ Pallas kernel -------------------------------

def _euler_rot_cols(ax, ay, az):
    """3x3 rotation R = Rz(az) @ Ry(ay) @ Rx(ax); entries are (B,1) columns."""
    sx, cx = jnp.sin(ax), jnp.cos(ax)
    sy, cy = jnp.sin(ay), jnp.cos(ay)
    sz, cz = jnp.sin(az), jnp.cos(az)
    return [
        [cz * cy, cz * sy * sx - sz * cx, cz * sy * cx + sz * sx],
        [sz * cy, sz * sy * sx + cz * cx, sz * sy * cx - cz * sx],
        [-sy,     cy * sx,                cy * cx],
    ]


def _rel_xfrm_cols(p1, p2):
    """Relative transform T(p1)^-1 @ T(p2) as 12 (B,1) columns: [t_rel, R_rel]."""
    t1 = [p1[:, i:i + 1] for i in range(3)]
    t2 = [p2[:, i:i + 1] for i in range(3)]
    r1 = _euler_rot_cols(p1[:, 3:4], p1[:, 4:5], p1[:, 5:6])
    r2 = _euler_rot_cols(p2[:, 3:4], p2[:, 4:5], p2[:, 5:6])
    dt = [t2[k] - t1[k] for k in range(3)]
    # t_rel = R1^T @ (t2 - t1)
    t_rel = [r1[0][i] * dt[0] + r1[1][i] * dt[1] + r1[2][i] * dt[2]
             for i in range(3)]
    # R_rel = R1^T @ R2  (row-major i*3 + j)
    r_rel = [r1[0][i] * r2[0][j] + r1[1][i] * r2[1][j] + r1[2][i] * r2[2][j]
             for i in range(3) for j in range(3)]
    return t_rel + r_rel


def _xform_mse_kernel(cam_ref, cam_roll_ref, ee_ref, ee_roll_ref, o_ref, *, inv_n):
    cam = cam_ref[...]          # (B, 6) f32
    cam_r = cam_roll_ref[...]
    ee = ee_ref[...]
    ee_r = ee_roll_ref[...]

    cam_x = _rel_xfrm_cols(cam, cam_r)   # 12 columns of shape (B, 1)
    ee_x = _rel_xfrm_cols(ee, ee_r)

    acc = jnp.zeros_like(cam[:, 0:1])    # (B, 1) f32 accumulator (stays in vregs)
    for c, e in zip(cam_x, ee_x):
        d = c - e
        acc = acc + d * d
    # mean over all B*12 elements -> (1, 1)
    o_ref[...] = jnp.sum(acc, axis=0, keepdims=True) * inv_n


def transformation_loss(pose_cam, pose_ee, shift):
    """Single fused Pallas call computing F.mse_loss(cam_xform, ee_xform)."""
    b, d = pose_ee.shape
    assert d == 6, "pose must be [x, y, z, rx, ry, rz]"
    # torch.roll(shifts=shift, dims=0) == jnp.roll(..., shift, axis=0)
    cam_rolled = jnp.roll(pose_cam, shift, axis=0)
    ee_rolled = jnp.roll(pose_ee, shift, axis=0)

    vmem = pl.BlockSpec(memory_space=pltpu.MemorySpace.VMEM)
    out = pl.pallas_call(
        functools.partial(_xform_mse_kernel, inv_n=1.0 / float(b * 12)),
        out_shape=jax.ShapeDtypeStruct((1, 1), jnp.float32),
        in_specs=[vmem, vmem, vmem, vmem],
        out_specs=vmem,
    )(pose_cam, cam_rolled, pose_ee, ee_rolled)
    return out[0, 0]


# ------------------------- independent XLA reference ------------------------

def _euler_to_R(angles):
    ax, ay, az = angles[..., 0], angles[..., 1], angles[..., 2]
    sx, cx = jnp.sin(ax), jnp.cos(ax)
    sy, cy = jnp.sin(ay), jnp.cos(ay)
    sz, cz = jnp.sin(az), jnp.cos(az)
    r = jnp.stack([
        cz * cy, cz * sy * sx - sz * cx, cz * sy * cx + sz * sx,
        sz * cy, sz * sy * sx + cz * cx, sz * sy * cx - cz * sx,
        -sy,     cy * sx,                cy * cx], axis=-1)
    return r.reshape(angles.shape[:-1] + (3, 3))


def _get_pose_xfrm_ref(p1, p2):
    t1, a1 = p1[:, :3], p1[:, 3:]
    t2, a2 = p2[:, :3], p2[:, 3:]
    R1 = _euler_to_R(a1)
    R2 = _euler_to_R(a2)
    R_rel = jnp.einsum('bki,bkj->bij', R1, R2)          # R1^T @ R2
    t_rel = jnp.einsum('bki,bk->bi', R1, t2 - t1)       # R1^T @ (t2 - t1)
    return jnp.concatenate([t_rel, R_rel.reshape(-1, 9)], axis=-1)


def reference_loss(pose_cam, pose_ee, shift):
    cam_x = _get_pose_xfrm_ref(pose_cam, jnp.roll(pose_cam, shift, axis=0))
    ee_x = _get_pose_xfrm_ref(pose_ee, jnp.roll(pose_ee, shift, axis=0))
    return jnp.mean((cam_x - ee_x) ** 2)


# ---------------------------------- main ------------------------------------

if __name__ == "__main__":
    random.seed(0)                      # host-side RNG for the roll offset (as in torch)
    key = jax.random.PRNGKey(0)

    B = 8                               # batch of poses; pose dim = 6
    kc, ke = jax.random.split(key)
    pose_cam = jax.random.normal(kc, (B, 6), jnp.float32)
    pose_ee = jax.random.normal(ke, (B, 6), jnp.float32)

    shift = random.randint(1, B)        # xform_idx_offset = random.randint(1, b)

    out = jax.block_until_ready(transformation_loss(pose_cam, pose_ee, shift))
    ref = jax.block_until_ready(reference_loss(pose_cam, pose_ee, shift))

    err = float(jnp.abs(out - ref))
    assert err < 1e-3 * (1.0 + float(jnp.abs(ref))), \
        f"mismatch: abs err {err} (ref {float(ref)})"

    print("KERNEL_OK")
</pallas_src>

<mosaic_0001>
module attributes {stable_mosaic.version = 11 : i64} {
  func.func @_xform_mse_kernel(%arg0: memref<8x6xf32, #tpu.memory_space<vmem>>, %arg1: memref<8x6xf32, #tpu.memory_space<vmem>>, %arg2: memref<8x6xf32, #tpu.memory_space<vmem>>, %arg3: memref<8x6xf32, #tpu.memory_space<vmem>>, %arg4: memref<1x1xf32, #tpu.memory_space<vmem>>) attributes {dimension_semantics = [], scalar_prefetch = 0 : i64, scratch_operands = 0 : i64, tpu.core_type = #tpu.core_type<tc>} {
    %c0 = arith.constant 0 : index
    %c0_0 = arith.constant 0 : index
    %0 = vector.load %arg0[%c0, %c0_0] : memref<8x6xf32, #tpu.memory_space<vmem>>, vector<8x6xf32>
    %c0_1 = arith.constant 0 : index
    %c0_2 = arith.constant 0 : index
    %1 = vector.load %arg1[%c0_1, %c0_2] : memref<8x6xf32, #tpu.memory_space<vmem>>, vector<8x6xf32>
    %c0_3 = arith.constant 0 : index
    %c0_4 = arith.constant 0 : index
    %2 = vector.load %arg2[%c0_3, %c0_4] : memref<8x6xf32, #tpu.memory_space<vmem>>, vector<8x6xf32>
    %c0_5 = arith.constant 0 : index
    %c0_6 = arith.constant 0 : index
    %3 = vector.load %arg3[%c0_5, %c0_6] : memref<8x6xf32, #tpu.memory_space<vmem>>, vector<8x6xf32>
    %4 = vector.extract_strided_slice %0 {offsets = [0, 0], sizes = [8, 1], strides = [1, 1]} : vector<8x6xf32> to vector<8x1xf32>
    %5 = vector.extract_strided_slice %0 {offsets = [0, 1], sizes = [8, 1], strides = [1, 1]} : vector<8x6xf32> to vector<8x1xf32>
    %6 = vector.extract_strided_slice %0 {offsets = [0, 2], sizes = [8, 1], strides = [1, 1]} : vector<8x6xf32> to vector<8x1xf32>
    %7 = vector.extract_strided_slice %1 {offsets = [0, 0], sizes = [8, 1], strides = [1, 1]} : vector<8x6xf32> to vector<8x1xf32>
    %8 = vector.extract_strided_slice %1 {offsets = [0, 1], sizes = [8, 1], strides = [1, 1]} : vector<8x6xf32> to vector<8x1xf32>
    %9 = vector.extract_strided_slice %1 {offsets = [0, 2], sizes = [8, 1], strides = [1, 1]} : vector<8x6xf32> to vector<8x1xf32>
    %10 = vector.extract_strided_slice %0 {offsets = [0, 3], sizes = [8, 1], strides = [1, 1]} : vector<8x6xf32> to vector<8x1xf32>
    %11 = vector.extract_strided_slice %0 {offsets = [0, 4], sizes = [8, 1], strides = [1, 1]} : vector<8x6xf32> to vector<8x1xf32>
    %12 = vector.extract_strided_slice %0 {offsets = [0, 5], sizes = [8, 1], strides = [1, 1]} : vector<8x6xf32> to vector<8x1xf32>
    %13 = math.sin %10 : vector<8x1xf32>
    %14 = math.cos %10 : vector<8x1xf32>
    %15 = math.sin %11 : vector<8x1xf32>
    %16 = math.cos %11 : vector<8x1xf32>
    %17 = math.sin %12 : vector<8x1xf32>
    %18 = math.cos %12 : vector<8x1xf32>
    %19 = arith.mulf %18, %16 : vector<8x1xf32>
    %20 = arith.mulf %18, %15 : vector<8x1xf32>
    %21 = arith.mulf %20, %13 : vector<8x1xf32>
    %22 = arith.mulf %17, %14 : vector<8x1xf32>
    %23 = arith.subf %21, %22 : vector<8x1xf32>
    %24 = arith.mulf %18, %15 : vector<8x1xf32>
    %25 = arith.mulf %24, %14 : vector<8x1xf32>
    %26 = arith.mulf %17, %13 : vector<8x1xf32>
    %27 = arith.addf %25, %26 : vector<8x1xf32>
    %28 = arith.mulf %17, %16 : vector<8x1xf32>
    %29 = arith.mulf %17, %15 : vector<8x1xf32>
    %30 = arith.mulf %29, %13 : vector<8x1xf32>
    %31 = arith.mulf %18, %14 : vector<8x1xf32>
    %32 = arith.addf %30, %31 : vector<8x1xf32>
    %33 = arith.mulf %17, %15 : vector<8x1xf32>
    %34 = arith.mulf %33, %14 : vector<8x1xf32>
    %35 = arith.mulf %18, %13 : vector<8x1xf32>
    %36 = arith.subf %34, %35 : vector<8x1xf32>
    %cst = arith.constant 0.000000e+00 : f32
    %37 = vector.broadcast %cst : f32 to vector<8x1xf32>
    %38 = arith.subf %37, %15 : vector<8x1xf32>
    %39 = arith.mulf %16, %13 : vector<8x1xf32>
    %40 = arith.mulf %16, %14 : vector<8x1xf32>
    %41 = vector.extract_strided_slice %1 {offsets = [0, 3], sizes = [8, 1], strides = [1, 1]} : vector<8x6xf32> to vector<8x1xf32>
    %42 = vector.extract_strided_slice %1 {offsets = [0, 4], sizes = [8, 1], strides = [1, 1]} : vector<8x6xf32> to vector<8x1xf32>
    %43 = vector.extract_strided_slice %1 {offsets = [0, 5], sizes = [8, 1], strides = [1, 1]} : vector<8x6xf32> to vector<8x1xf32>
    %44 = math.sin %41 : vector<8x1xf32>
    %45 = math.cos %41 : vector<8x1xf32>
    %46 = math.sin %42 : vector<8x1xf32>
    %47 = math.cos %42 : vector<8x1xf32>
    %48 = math.sin %43 : vector<8x1xf32>
    %49 = math.cos %43 : vector<8x1xf32>
    %50 = arith.mulf %49, %47 : vector<8x1xf32>
    %51 = arith.mulf %49, %46 : vector<8x1xf32>
    %52 = arith.mulf %51, %44 : vector<8x1xf32>
    %53 = arith.mulf %48, %45 : vector<8x1xf32>
    %54 = arith.subf %52, %53 : vector<8x1xf32>
    %55 = arith.mulf %49, %46 : vector<8x1xf32>
    %56 = arith.mulf %55, %45 : vector<8x1xf32>
    %57 = arith.mulf %48, %44 : vector<8x1xf32>
    %58 = arith.addf %56, %57 : vector<8x1xf32>
    %59 = arith.mulf %48, %47 : vector<8x1xf32>
    %60 = arith.mulf %48, %46 : vector<8x1xf32>
    %61 = arith.mulf %60, %44 : vector<8x1xf32>
    %62 = arith.mulf %49, %45 : vector<8x1xf32>
    %63 = arith.addf %61, %62 : vector<8x1xf32>
    %64 = arith.mulf %48, %46 : vector<8x1xf32>
    %65 = arith.mulf %64, %45 : vector<8x1xf32>
    %66 = arith.mulf %49, %44 : vector<8x1xf32>
    %67 = arith.subf %65, %66 : vector<8x1xf32>
    %cst_7 = arith.constant 0.000000e+00 : f32
    %68 = vector.broadcast %cst_7 : f32 to vector<8x1xf32>
    %69 = arith.subf %68, %46 : vector<8x1xf32>
    %70 = arith.mulf %47, %44 : vector<8x1xf32>
    %71 = arith.mulf %47, %45 : vector<8x1xf32>
    %72 = arith.subf %7, %4 : vector<8x1xf32>
    %73 = arith.subf %8, %5 : vector<8x1xf32>
    %74 = arith.subf %9, %6 : vector<8x1xf32>
    %75 = arith.mulf %19, %72 : vector<8x1xf32>
    %76 = arith.mulf %28, %73 : vector<8x1xf32>
    %77 = arith.addf %75, %76 : vector<8x1xf32>
    %78 = arith.mulf %38, %74 : vector<8x1xf32>
    %79 = arith.addf %77, %78 : vector<8x1xf32>
    %80 = arith.mulf %23, %72 : vector<8x1xf32>
    %81 = arith.mulf %32, %73 : vector<8x1xf32>
    %82 = arith.addf %80, %81 : vector<8x1xf32>
    %83 = arith.mulf %39, %74 : vector<8x1xf32>
    %84 = arith.addf %82, %83 : vector<8x1xf32>
    %85 = arith.mulf %27, %72 : vector<8x1xf32>
    %86 = arith.mulf %36, %73 : vector<8x1xf32>
    %87 = arith.addf %85, %86 : vector<8x1xf32>
    %88 = arith.mulf %40, %74 : vector<8x1xf32>
    %89 = arith.addf %87, %88 : vector<8x1xf32>
    %90 = arith.mulf %19, %50 : vector<8x1xf32>
    %91 = arith.mulf %28, %59 : vector<8x1xf32>
    %92 = arith.addf %90, %91 : vector<8x1xf32>
    %93 = arith.mulf %38, %69 : vector<8x1xf32>
    %94 = arith.addf %92, %93 : vector<8x1xf32>
    %95 = arith.mulf %19, %54 : vector<8x1xf32>
    %96 = arith.mulf %28, %63 : vector<8x1xf32>
    %97 = arith.addf %95, %96 : vector<8x1xf32>
    %98 = arith.mulf %38, %70 : vector<8x1xf32>
    %99 = arith.addf %97, %98 : vector<8x1xf32>
    %100 = arith.mulf %19, %58 : vector<8x1xf32>
    %101 = arith.mulf %28, %67 : vector<8x1xf32>
    %102 = arith.addf %100, %101 : vector<8x1xf32>
    %103 = arith.mulf %38, %71 : vector<8x1xf32>
    %104 = arith.addf %102, %103 : vector<8x1xf32>
    %105 = arith.mulf %23, %50 : vector<8x1xf32>
    %106 = arith.mulf %32, %59 : vector<8x1xf32>
    %107 = arith.addf %105, %106 : vector<8x1xf32>
    %108 = arith.mulf %39, %69 : vector<8x1xf32>
    %109 = arith.addf %107, %108 : vector<8x1xf32>
    %110 = arith.mulf %23, %54 : vector<8x1xf32>
    %111 = arith.mulf %32, %63 : vector<8x1xf32>
    %112 = arith.addf %110, %111 : vector<8x1xf32>
    %113 = arith.mulf %39, %70 : vector<8x1xf32>
    %114 = arith.addf %112, %113 : vector<8x1xf32>
    %115 = arith.mulf %23, %58 : vector<8x1xf32>
    %116 = arith.mulf %32, %67 : vector<8x1xf32>
    %117 = arith.addf %115, %116 : vector<8x1xf32>
    %118 = arith.mulf %39, %71 : vector<8x1xf32>
    %119 = arith.addf %117, %118 : vector<8x1xf32>
    %120 = arith.mulf %27, %50 : vector<8x1xf32>
    %121 = arith.mulf %36, %59 : vector<8x1xf32>
    %122 = arith.addf %120, %121 : vector<8x1xf32>
    %123 = arith.mulf %40, %69 : vector<8x1xf32>
    %124 = arith.addf %122, %123 : vector<8x1xf32>
    %125 = arith.mulf %27, %54 : vector<8x1xf32>
    %126 = arith.mulf %36, %63 : vector<8x1xf32>
    %127 = arith.addf %125, %126 : vector<8x1xf32>
    %128 = arith.mulf %40, %70 : vector<8x1xf32>
    %129 = arith.addf %127, %128 : vector<8x1xf32>
    %130 = arith.mulf %27, %58 : vector<8x1xf32>
    %131 = arith.mulf %36, %67 : vector<8x1xf32>
    %132 = arith.addf %130, %131 : vector<8x1xf32>
    %133 = arith.mulf %40, %71 : vector<8x1xf32>
    %134 = arith.addf %132, %133 : vector<8x1xf32>
    %135 = vector.extract_strided_slice %2 {offsets = [0, 0], sizes = [8, 1], strides = [1, 1]} : vector<8x6xf32> to vector<8x1xf32>
    %136 = vector.extract_strided_slice %2 {offsets = [0, 1], sizes = [8, 1], strides = [1, 1]} : vector<8x6xf32> to vector<8x1xf32>
    %137 = vector.extract_strided_slice %2 {offsets = [0, 2], sizes = [8, 1], strides = [1, 1]} : vector<8x6xf32> to vector<8x1xf32>
    %138 = vector.extract_strided_slice %3 {offsets = [0, 0], sizes = [8, 1], strides = [1, 1]} : vector<8x6xf32> to vector<8x1xf32>
    %139 = vector.extract_strided_slice %3 {offsets = [0, 1], sizes = [8, 1], strides = [1, 1]} : vector<8x6xf32> to vector<8x1xf32>
    %140 = vector.extract_strided_slice %3 {offsets = [0, 2], sizes = [8, 1], strides = [1, 1]} : vector<8x6xf32> to vector<8x1xf32>
    %141 = vector.extract_strided_slice %2 {offsets = [0, 3], sizes = [8, 1], strides = [1, 1]} : vector<8x6xf32> to vector<8x1xf32>
    %142 = vector.extract_strided_slice %2 {offsets = [0, 4], sizes = [8, 1], strides = [1, 1]} : vector<8x6xf32> to vector<8x1xf32>
    %143 = vector.extract_strided_slice %2 {offsets = [0, 5], sizes = [8, 1], strides = [1, 1]} : vector<8x6xf32> to vector<8x1xf32>
    %144 = math.sin %141 : vector<8x1xf32>
    %145 = math.cos %141 : vector<8x1xf32>
    %146 = math.sin %142 : vector<8x1xf32>
    %147 = math.cos %142 : vector<8x1xf32>
    %148 = math.sin %143 : vector<8x1xf32>
    %149 = math.cos %143 : vector<8x1xf32>
    %150 = arith.mulf %149, %147 : vector<8x1xf32>
    %151 = arith.mulf %149, %146 : vector<8x1xf32>
    %152 = arith.mulf %151, %144 : vector<8x1xf32>
    %153 = arith.mulf %148, %145 : vector<8x1xf32>
    %154 = arith.subf %152, %153 : vector<8x1xf32>
    %155 = arith.mulf %149, %146 : vector<8x1xf32>
    %156 = arith.mulf %155, %145 : vector<8x1xf32>
    %157 = arith.mulf %148, %144 : vector<8x1xf32>
    %158 = arith.addf %156, %157 : vector<8x1xf32>
    %159 = arith.mulf %148, %147 : vector<8x1xf32>
    %160 = arith.mulf %148, %146 : vector<8x1xf32>
    %161 = arith.mulf %160, %144 : vector<8x1xf32>
    %162 = arith.mulf %149, %145 : vector<8x1xf32>
    %163 = arith.addf %161, %162 : vector<8x1xf32>
    %164 = arith.mulf %148, %146 : vector<8x1xf32>
    %165 = arith.mulf %164, %145 : vector<8x1xf32>
    %166 = arith.mulf %149, %144 : vector<8x1xf32>
    %167 = arith.subf %165, %166 : vector<8x1xf32>
    %cst_8 = arith.constant 0.000000e+00 : f32
    %168 = vector.broadcast %cst_8 : f32 to vector<8x1xf32>
    %169 = arith.subf %168, %146 : vector<8x1xf32>
    %170 = arith.mulf %147, %144 : vector<8x1xf32>
    %171 = arith.mulf %147, %145 : vector<8x1xf32>
    %172 = vector.extract_strided_slice %3 {offsets = [0, 3], sizes = [8, 1], strides = [1, 1]} : vector<8x6xf32> to vector<8x1xf32>
    %173 = vector.extract_strided_slice %3 {offsets = [0, 4], sizes = [8, 1], strides = [1, 1]} : vector<8x6xf32> to vector<8x1xf32>
    %174 = vector.extract_strided_slice %3 {offsets = [0, 5], sizes = [8, 1], strides = [1, 1]} : vector<8x6xf32> to vector<8x1xf32>
    %175 = math.sin %172 : vector<8x1xf32>
    %176 = math.cos %172 : vector<8x1xf32>
    %177 = math.sin %173 : vector<8x1xf32>
    %178 = math.cos %173 : vector<8x1xf32>
    %179 = math.sin %174 : vector<8x1xf32>
    %180 = math.cos %174 : vector<8x1xf32>
    %181 = arith.mulf %180, %178 : vector<8x1xf32>
    %182 = arith.mulf %180, %177 : vector<8x1xf32>
    %183 = arith.mulf %182, %175 : vector<8x1xf32>
    %184 = arith.mulf %179, %176 : vector<8x1xf32>
    %185 = arith.subf %183, %184 : vector<8x1xf32>
    %186 = arith.mulf %180, %177 : vector<8x1xf32>
    %187 = arith.mulf %186, %176 : vector<8x1xf32>
    %188 = arith.mulf %179, %175 : vector<8x1xf32>
    %189 = arith.addf %187, %188 : vector<8x1xf32>
    %190 = arith.mulf %179, %178 : vector<8x1xf32>
    %191 = arith.mulf %179, %177 : vector<8x1xf32>
    %192 = arith.mulf %191, %175 : vector<8x1xf32>
    %193 = arith.mulf %180, %176 : vector<8x1xf32>
    %194 = arith.addf %192, %193 : vector<8x1xf32>
    %195 = arith.mulf %179, %177 : vector<8x1xf32>
    %196 = arith.mulf %195, %176 : vector<8x1xf32>
    %197 = arith.mulf %180, %175 : vector<8x1xf32>
    %198 = arith.subf %196, %197 : vector<8x1xf32>
    %cst_9 = arith.constant 0.000000e+00 : f32
    %199 = vector.broadcast %cst_9 : f32 to vector<8x1xf32>
    %200 = arith.subf %199, %177 : vector<8x1xf32>
    %201 = arith.mulf %178, %175 : vector<8x1xf32>
    %202 = arith.mulf %178, %176 : vector<8x1xf32>
    %203 = arith.subf %138, %135 : vector<8x1xf32>
    %204 = arith.subf %139, %136 : vector<8x1xf32>
    %205 = arith.subf %140, %137 : vector<8x1xf32>
    %206 = arith.mulf %150, %203 : vector<8x1xf32>
    %207 = arith.mulf %159, %204 : vector<8x1xf32>
    %208 = arith.addf %206, %207 : vector<8x1xf32>
    %209 = arith.mulf %169, %205 : vector<8x1xf32>
    %210 = arith.addf %208, %209 : vector<8x1xf32>
    %211 = arith.mulf %154, %203 : vector<8x1xf32>
    %212 = arith.mulf %163, %204 : vector<8x1xf32>
    %213 = arith.addf %211, %212 : vector<8x1xf32>
    %214 = arith.mulf %170, %205 : vector<8x1xf32>
    %215 = arith.addf %213, %214 : vector<8x1xf32>
    %216 = arith.mulf %158, %203 : vector<8x1xf32>
    %217 = arith.mulf %167, %204 : vector<8x1xf32>
    %218 = arith.addf %216, %217 : vector<8x1xf32>
    %219 = arith.mulf %171, %205 : vector<8x1xf32>
    %220 = arith.addf %218, %219 : vector<8x1xf32>
    %221 = arith.mulf %150, %181 : vector<8x1xf32>
    %222 = arith.mulf %159, %190 : vector<8x1xf32>
    %223 = arith.addf %221, %222 : vector<8x1xf32>
    %224 = arith.mulf %169, %200 : vector<8x1xf32>
    %225 = arith.addf %223, %224 : vector<8x1xf32>
    %226 = arith.mulf %150, %185 : vector<8x1xf32>
    %227 = arith.mulf %159, %194 : vector<8x1xf32>
    %228 = arith.addf %226, %227 : vector<8x1xf32>
    %229 = arith.mulf %169, %201 : vector<8x1xf32>
    %230 = arith.addf %228, %229 : vector<8x1xf32>
    %231 = arith.mulf %150, %189 : vector<8x1xf32>
    %232 = arith.mulf %159, %198 : vector<8x1xf32>
    %233 = arith.addf %231, %232 : vector<8x1xf32>
    %234 = arith.mulf %169, %202 : vector<8x1xf32>
    %235 = arith.addf %233, %234 : vector<8x1xf32>
    %236 = arith.mulf %154, %181 : vector<8x1xf32>
    %237 = arith.mulf %163, %190 : vector<8x1xf32>
    %238 = arith.addf %236, %237 : vector<8x1xf32>
    %239 = arith.mulf %170, %200 : vector<8x1xf32>
    %240 = arith.addf %238, %239 : vector<8x1xf32>
    %241 = arith.mulf %154, %185 : vector<8x1xf32>
    %242 = arith.mulf %163, %194 : vector<8x1xf32>
    %243 = arith.addf %241, %242 : vector<8x1xf32>
    %244 = arith.mulf %170, %201 : vector<8x1xf32>
    %245 = arith.addf %243, %244 : vector<8x1xf32>
    %246 = arith.mulf %154, %189 : vector<8x1xf32>
    %247 = arith.mulf %163, %198 : vector<8x1xf32>
    %248 = arith.addf %246, %247 : vector<8x1xf32>
    %249 = arith.mulf %170, %202 : vector<8x1xf32>
    %250 = arith.addf %248, %249 : vector<8x1xf32>
    %251 = arith.mulf %158, %181 : vector<8x1xf32>
    %252 = arith.mulf %167, %190 : vector<8x1xf32>
    %253 = arith.addf %251, %252 : vector<8x1xf32>
    %254 = arith.mulf %171, %200 : vector<8x1xf32>
    %255 = arith.addf %253, %254 : vector<8x1xf32>
    %256 = arith.mulf %158, %185 : vector<8x1xf32>
    %257 = arith.mulf %167, %194 : vector<8x1xf32>
    %258 = arith.addf %256, %257 : vector<8x1xf32>
    %259 = arith.mulf %171, %201 : vector<8x1xf32>
    %260 = arith.addf %258, %259 : vector<8x1xf32>
    %261 = arith.mulf %158, %189 : vector<8x1xf32>
    %262 = arith.mulf %167, %198 : vector<8x1xf32>
    %263 = arith.addf %261, %262 : vector<8x1xf32>
    %264 = arith.mulf %171, %202 : vector<8x1xf32>
    %265 = arith.addf %263, %264 : vector<8x1xf32>
    %cst_10 = arith.constant 0.000000e+00 : f32
    %266 = vector.broadcast %cst_10 : f32 to vector<8x1xf32>
    %267 = arith.subf %79, %210 : vector<8x1xf32>
    %268 = arith.mulf %267, %267 : vector<8x1xf32>
    %269 = arith.addf %266, %268 : vector<8x1xf32>
    %270 = arith.subf %84, %215 : vector<8x1xf32>
    %271 = arith.mulf %270, %270 : vector<8x1xf32>
    %272 = arith.addf %269, %271 : vector<8x1xf32>
    %273 = arith.subf %89, %220 : vector<8x1xf32>
    %274 = arith.mulf %273, %273 : vector<8x1xf32>
    %275 = arith.addf %272, %274 : vector<8x1xf32>
    %276 = arith.subf %94, %225 : vector<8x1xf32>
    %277 = arith.mulf %276, %276 : vector<8x1xf32>
    %278 = arith.addf %275, %277 : vector<8x1xf32>
    %279 = arith.subf %99, %230 : vector<8x1xf32>
    %280 = arith.mulf %279, %279 : vector<8x1xf32>
    %281 = arith.addf %278, %280 : vector<8x1xf32>
    %282 = arith.subf %104, %235 : vector<8x1xf32>
    %283 = arith.mulf %282, %282 : vector<8x1xf32>
    %284 = arith.addf %281, %283 : vector<8x1xf32>
    %285 = arith.subf %109, %240 : vector<8x1xf32>
    %286 = arith.mulf %285, %285 : vector<8x1xf32>
    %287 = arith.addf %284, %286 : vector<8x1xf32>
    %288 = arith.subf %114, %245 : vector<8x1xf32>
    %289 = arith.mulf %288, %288 : vector<8x1xf32>
    %290 = arith.addf %287, %289 : vector<8x1xf32>
    %291 = arith.subf %119, %250 : vector<8x1xf32>
    %292 = arith.mulf %291, %291 : vector<8x1xf32>
    %293 = arith.addf %290, %292 : vector<8x1xf32>
    %294 = arith.subf %124, %255 : vector<8x1xf32>
    %295 = arith.mulf %294, %294 : vector<8x1xf32>
    %296 = arith.addf %293, %295 : vector<8x1xf32>
    %297 = arith.subf %129, %260 : vector<8x1xf32>
    %298 = arith.mulf %297, %297 : vector<8x1xf32>
    %299 = arith.addf %296, %298 : vector<8x1xf32>
    %300 = arith.subf %134, %265 : vector<8x1xf32>
    %301 = arith.mulf %300, %300 : vector<8x1xf32>
    %302 = arith.addf %299, %301 : vector<8x1xf32>
    %cst_11 = arith.constant dense<0.000000e+00> : vector<1xf32>
    %303 = vector.multi_reduction <add>, %302, %cst_11 [0] : vector<8x1xf32> to vector<1xf32>
    %304 = vector.shape_cast %303 : vector<1xf32> to vector<1x1xf32>
    %cst_12 = arith.constant 0.010416667 : f32
    %305 = vector.broadcast %cst_12 : f32 to vector<1x1xf32>
    %306 = arith.mulf %304, %305 : vector<1x1xf32>
    %c0_13 = arith.constant 0 : index
    %c0_14 = arith.constant 0 : index
    %307 = vector.load %arg4[%c0_13, %c0_14] : memref<1x1xf32, #tpu.memory_space<vmem>>, vector<1x1xf32>
    tpu.vector_store %arg4[%c0_13, %c0_14], %306 {strides = array<i32>} : memref<1x1xf32, #tpu.memory_space<vmem>>, vector<1x1xf32>,
    return
  }
}

</mosaic_0001>

<bundles_post_ra>
// kernel: tpu_custom_call.1
= control target key start
LH: loop header
LB: loop body
LE: loop exit
PB: predicated region body
PF: predicated region fallthrough
CT: control target
= control target key end

     0   :  { %9 = vsyncpa [#allocation3], 0  ;;  %s2285_s0 = inlined_call_operand.hbm [shape: f32[8,6], index: 0, kind: input, shape index: {}]   ;;  %s2286_s1 = inlined_call_operand.hbm [shape: f32[8,6], index: 1, kind: input, shape index: {}]   ;;  %s2287_s2 = inlined_call_operand.hbm [shape: f32[8,6], index: 2, kind: input, shape index: {}]   ;;  %s2288_s3 = inlined_call_operand.hbm [shape: f32[8,6], index: 3, kind: input, shape index: {}]   ;;  %s2289_s4 = inlined_call_operand.hbm [shape: f32[1,1], index: 4, kind: output, shape index: {}]  }
   0x1   :  { %10 = vsyncpa [#allocation6], 0 }
   0x2   :  { %11 = vsyncpa [#allocation9], 0 }
   0x3   :  { %12 = vsyncpa [#allocation4], 0  ;;  %s1513_s15 = smov [#allocation5]   ;;  %s1514_s17 = smov [#allocation2]  }
   0x4   :  { %s29_s16 = sshll.u32 %s1513_s15, 4  ;;  %s19_s18 = sshll.u32 %s1514_s17, 4  ;;  %s30_s16 = int_to_ptr.vmem [resolvable:$true] %s29_s16  ;;  %s20_s18 = int_to_ptr.vmem [resolvable:$true] %s19_s18 }
   0x5   :  { %s1413_s19 = scalar_lea.vmem %s30_s16, 128  ;;  %p1418_p1 = scmp.lt.s32.totalorder %s30_s16, %s30_s16 }
   0x6   :  { %p1414_p0 = scmp.ne.s32.totalorder %s30_s16, %s1413_s19  ;;  %p1419_p2 = scmp.lt.s32.totalorder %s1413_s19, %s1413_s19 }
   0x8   :  { %p1420_p3 = por %p1419_p2, %p1418_p1 }
   0xa   :  { %p1421_p4 = pnand %p1420_p3, %p1414_p0 }
   0xc   :  { %1424 = shalt.err (!%p1421_p4)
}
   0xd   :  { %32 = dma.hbm_to_vmem [thread:$0]  %s2286_s1, 128, %s30_s16, [#allocation6]  }
   0xe   :  { %s1433_s22 = scalar_lea.vmem %s20_s18, 128  ;;  %p1438_p6 = scmp.lt.s32.totalorder %s20_s18, %s20_s18 }
   0xf   :  { %p1434_p5 = scmp.ne.s32.totalorder %s20_s18, %s1433_s22  ;;  %p1439_p7 = scmp.lt.s32.totalorder %s1433_s22, %s1433_s22 }
  0x11   :  { %p1440_p8 = por %p1439_p7, %p1438_p6 }
  0x13   :  { %p1441_p9 = pnand %p1440_p8, %p1434_p5 }
  0x15   :  { %1444 = shalt.err (!%p1441_p9)
}
  0x16   :  { %22 = dma.hbm_to_vmem [thread:$0]  %s2285_s0, 128, %s20_s18, [#allocation3]  }
  0x17   :  { %s1515_s25 = smov [#allocation7]   ;;  %s1516_s27 = smov [#allocation8]  }
  0x18   :  { %s39_s26 = sshll.u32 %s1515_s25, 4  ;;  %s49_s28 = sshll.u32 %s1516_s27, 4  ;;  %s40_s26 = int_to_ptr.vmem [resolvable:$true] %s39_s26  ;;  %s50_s28 = int_to_ptr.vmem [resolvable:$true] %s49_s28 }
  0x19   :  { %s1453_s29 = scalar_lea.vmem %s40_s26, 128  ;;  %p1458_p11 = scmp.lt.s32.totalorder %s40_s26, %s40_s26 }
  0x1a   :  { %p1454_p10 = scmp.ne.s32.totalorder %s40_s26, %s1453_s29  ;;  %p1459_p12 = scmp.lt.s32.totalorder %s1453_s29, %s1453_s29 }
  0x1c   :  { %p1460_p13 = por %p1459_p12, %p1458_p11 }
  0x1e   :  { %p1461_p0 = pnand %p1460_p13, %p1454_p10 }
  0x20   :  { %1464 = shalt.err (!%p1461_p0)
}
  0x21   :  { %42 = dma.hbm_to_vmem [thread:$0]  %s2287_s2, 128, %s40_s26, [#allocation6]  }
  0x22   :  { %s1473_s5 = scalar_lea.vmem %s50_s28, 128  ;;  %p1478_p2 = scmp.lt.s32.totalorder %s50_s28, %s50_s28 }
  0x23   :  { %p1474_p1 = scmp.ne.s32.totalorder %s50_s28, %s1473_s5  ;;  %p1479_p3 = scmp.lt.s32.totalorder %s1473_s5, %s1473_s5 }
  0x25   :  { %p1480_p4 = por %p1479_p3, %p1478_p2 }
  0x27   :  { %p1481_p5 = pnand %p1480_p4, %p1474_p1 }
  0x29   :  { %1484 = shalt.err (!%p1481_p5)
}
  0x2a   :  { %52 = dma.hbm_to_vmem [thread:$0]  %s2288_s3, 128, %s50_s28, [#allocation9]  }
  0x2b   :  { %1505 = dma.done.wait [#allocation3], 128  }
  0x2c   :  { %1506 = vsyncadd [#allocation3], 4294967168 }
  0x2d   :  { %1507 = dma.done.wait [#allocation6], 256  }
  0x2e   :  { %1508 = vsyncadd [#allocation6], 4294967040 }
  0x2f   :  { %1509 = dma.done.wait [#allocation9], 128  }
  0x30   :  { %1510 = vsyncadd [#allocation9], 4294967168  ;;  %v1566_v0 = vld [vmem:[#allocation2] sm:$0xff]  ;;  %v1568_v1 = vld [vmem:[#allocation5] sm:$0xff]  ;;  %s1517_s2 = smov 2   ;;  %s1524_s3 = smov 1  }
  0x31   :  { %v1570_v2 = vld [vmem:[#allocation7] sm:$0xff]  ;;  %v307_v3 = vand.u32 2147483647, %v1568_v1  ;;  %v310_v4 = vand.u32 2139095040, %v1568_v1  ;;  %v1576_v5 = vsub.f32 %v1568_v1, %v1566_v0  ;;  %v72_v6 = vand.u32 2139095040, %v1566_v0  ;;  %v1585_v13 = vld [vmem:[#allocation8] sm:$0xff] }
  0x32   :  { %v666_v7 = vand.u32 2139095040, %v1570_v2  ;;  %v663_v10 = vand.u32 2147483647, %v1570_v2  ;;  %v1589_v16 = vsub.f32 %v1585_v13, %v1570_v2  ;;  %v904_v23 = vand.u32 2139095040, %v1585_v13  ;;  %s1525_s7 = smov 4   ;;  %s1526_s8 = smov 5  }
  0x33   :  { %v311_v8 = vshrl.u32 %v310_v4, 23  ;;  %556 = vrot.lane.b32.xlu1 %v1576_v5, %s1517_s2  ;;  %v314_v9 = vand.u32 8388607, %v307_v3  ;;  %v73_v14 = vshrl.u32 %v72_v6, 23  ;;  %v1518_v29 = vmov 683565275  }
  0x34   :  { %v667_v11 = vshrl.u32 %v666_v7, 23  ;;  %v670_v19 = vand.u32 8388607, %v663_v10  ;;  %v1519_v31 = vmov 2475754826   ;;  %v905_v40 = vshrl.u32 %v904_v23, 23 }
  0x35   :  { %v1333_v12 = vadd.s32 4294967169, %v311_v8  ;;  %v315_v18 = vor.u32 8388608, %v314_v9  ;;  %v1325_v22 = vadd.s32 4294967169, %v73_v14  ;;  %v1520_v33 = vmov 2131351028   ;;  %s1527_s9 = smov 123  }
  0x36   :  { %v1341_v15 = vadd.s32 4294967169, %v667_v11  ;;  %v671_v27 = vor.u32 8388608, %v670_v19  ;;  %v1521_v35 = vmov 2102212464   ;;  %v1522_v37 = vmov 920167782  }
  0x37   :  { %v317_v17 = vadd.s32 1, %v1333_v12  ;;  %1150 = vrot.lane.b32.xlu1 %v1589_v16, %s1517_s2  ;;  %v1596_v26 = vshll.u32 %v315_v18, 8  ;;  %v79_v39 = vadd.s32 1, %v1325_v22  ;;  %v1523_v46 = vmov 1326507024   ;;  %s1528_s10 = smov [#allocation10]  }
  0x38   :  { %v673_v20 = vadd.s32 1, %v1341_v15  ;;  %v901_v4 = vand.u32 2147483647, %v1585_v13  ;;  %v1621_v18 = vshll.u32 %v671_v27, 8  ;;  %v1349_v19 = vadd.s32 4294967169, %v905_v40  ;;  %s1314_s11 = sshll.u32 %s1528_s10, 4  ;;  %s1315_s11 = int_to_ptr.vmem [resolvable:$true] %s1314_s11 }
  0x39   :  { %vm318_vm0 = vcmp.gt.s32.totalorder %v317_v17, 0  ;;  %vm80_vm6 = vcmp.gt.s32.totalorder %v79_v39, 0  ;;  %s1485_s12 = scalar_lea.vmem %s1315_s11, 16  ;;  %s1489_s13 = scalar_lea.vmem %s1315_s11, 32 }
  0x3a   :  { %v319_v21 = vsel %vm318_vm0, %v317_v17, 0  ;;  %vm674_vm1 = vcmp.gt.s32.totalorder %v673_v20, 0  ;;  %p1486_p6 = scmp.ne.s32.totalorder %s1315_s11, %s1485_s12  ;;  %p1490_p7 = scmp.lt.s32.totalorder %s1315_s11, %s1315_s11 }
  0x3b   :  { %v321_v24 = vand.u32 31, %v319_v21  ;;  %v320_v25 = vshrl.u32 %v319_v21, 5  ;;  %v675_v48 = vsel %vm674_vm1, %v673_v20, 0  ;;  %v1623_v20 = vsel %vm80_vm6, %v79_v39, 0  ;;  %p1491_p8 = scmp.lt.s32.totalorder %s1489_s13, %s1485_s12 }
  0x3c   :  { %v677_v61 = vand.u32 31, %v675_v48  ;;  %v676_v21 = vshrl.u32 %v675_v48, 5 }
  0x3d   :  { %v322_v28 = vsub.s32 32, %v321_v24  ;;  %v324_v30 = vshll.u32 %v1518_v29, %v321_v24  ;;  %v327_v32 = vshll.u32 %v1519_v31, %v321_v24  ;;  %v330_v34 = vshll.u32 %v1520_v33, %v321_v24  ;;  %p1492_p9 = por %p1491_p8, %p1490_p7 }
  0x3e   :  { %v333_v36 = vshll.u32 %v1521_v35, %v321_v24  ;;  %v336_v38 = vshll.u32 %v1522_v37, %v321_v24  ;;  %vm339_vm2 = vcmp.lt.s32.totalorder %v320_v25, 1  ;;  %vm342_vm3 = vcmp.lt.s32.totalorder %v320_v25, 4 }
  0x3f   :  { %v323_v41 = vshrl.u32 %v1518_v29, %v322_v28  ;;  %v325_v42 = vshrl.u32 %v1519_v31, %v322_v28  ;;  %v328_v43 = vshrl.u32 %v1520_v33, %v322_v28  ;;  %v331_v44 = vshrl.u32 %v1521_v35, %v322_v28  ;;  %p1493_p10 = pnand %p1492_p9, %p1486_p6 }
  0x40   :  { %v334_v45 = vshrl.u32 %v1522_v37, %v322_v28  ;;  %v337_v47 = vshrl.u32 %v1523_v46, %v322_v28  ;;  %vm340_vm4 = vcmp.lt.s32.totalorder %v320_v25, 2  ;;  %vm341_vm5 = vcmp.lt.s32.totalorder %v320_v25, 3 }
  0x41   :  { %v326_v49 = vor.u32 %v325_v42, %v324_v30  ;;  %v329_v50 = vor.u32 %v328_v43, %v327_v32  ;;  %v332_v51 = vor.u32 %v331_v44, %v330_v34  ;;  %v678_v15 = vsub.s32 32, %v677_v61 }
  0x42   :  { %v335_v52 = vor.u32 %v334_v45, %v333_v36  ;;  %v338_v53 = vor.u32 %v337_v47, %v336_v38  ;;  %v680_v17 = vshll.u32 %v1518_v29, %v677_v61  ;;  %v683_v22 = vshll.u32 %v1519_v31, %v677_v61 }
  0x43   :  { %v343_v54 = vsel %vm339_vm2, %v323_v41, %v326_v49  ;;  %v344_v55 = vsel %vm342_vm3, %v332_v51, 2102212464  ;;  %v347_v56 = vsel %vm339_vm2, %v326_v49, %v329_v50  ;;  %v351_v57 = vsel %vm339_vm2, %v329_v50, %v332_v51 }
  0x44   :  { %v345_v58 = vsel %vm341_vm5, %v329_v50, %v344_v55  ;;  %v348_v59 = vsel %vm342_vm3, %v335_v52, 920167782  ;;  %v352_v60 = vsel %vm342_vm3, %v338_v53, 1326507024  ;;  %v686_v23 = vshll.u32 %v1520_v33, %v677_v61 }
  0x45   :  { %v349_v62 = vsel %vm341_vm5, %v332_v51, %v348_v59  ;;  %v353_v63 = vsel %vm341_vm5, %v335_v52, %v352_v60  ;;  %v346_v6 = vsel %vm340_vm4, %v343_v54, %v345_v58  ;;  %v681_v25 = vshrl.u32 %v1519_v31, %v678_v15 }
  0x46   :  { %v350_v7 = vsel %vm340_vm4, %v347_v56, %v349_v62  ;;  %v354_v8 = vsel %vm340_vm4, %v351_v57, %v353_v63  ;;  %v362_v24 = vmul.u32 %v1596_v26, %v346_v6  ;;  %v684_v28 = vshrl.u32 %v1520_v33, %v678_v15 }
  0x47   :  { %v1612_v9 = vmul.u32.u64.low %v1596_v26, %v354_v8  ;;  %v1613_v11 = vmul.u32.u64.high %v1596_v26, %v354_v8, %v1612_v9  ;;  %v1616_v12 = vmul.u32.u64.low %v1596_v26, %v350_v7  ;;  %v1617_v14 = vmul.u32.u64.high %v1596_v26, %v350_v7, %v1616_v12 }
  0x48   :  { %v689_v30 = vshll.u32 %v1521_v35, %v677_v61  ;;  %v679_v32 = vshrl.u32 %v1518_v29, %v678_v15  ;;  %v687_v34 = vshrl.u32 %v1521_v35, %v678_v15  ;;  %v682_v36 = vor.u32 %v681_v25, %v680_v17 }
  0x49   :  { %vm364_vm7 = vc.u32 %v1613_v11, %v1616_v12  ;;  %v365_v27 = vadd.s32 1, %v1617_v14  ;;  %v685_v38 = vor.u32 %v684_v28, %v683_v22  ;;  %v690_v39 = vshrl.u32 %v1522_v37, %v678_v15 }
  0x4a   :  { %v692_v26 = vshll.u32 %v1522_v37, %v677_v61  ;;  %v688_v41 = vor.u32 %v687_v34, %v686_v23  ;;  %v693_v42 = vshrl.u32 %v1523_v46, %v678_v15  ;;  %vm695_vm8 = vcmp.lt.s32.totalorder %v676_v21, 1 }
  0x4b   :  { %v366_v40 = vsel %vm364_vm7, %v365_v27, %v1617_v14  ;;  %v691_v44 = vor.u32 %v690_v39, %v689_v30  ;;  %vm696_vm9 = vcmp.lt.s32.totalorder %v676_v21, 2  ;;  %vm697_vm10 = vcmp.lt.s32.totalorder %v676_v21, 3 }
  0x4c   :  { %v367_v43 = vadd.s32 %v366_v40, %v362_v24  ;;  %v694_v45 = vor.u32 %v693_v42, %v692_v26  ;;  %vm698_vm11 = vcmp.lt.s32.totalorder %v676_v21, 4  ;;  %v699_v47 = vsel %vm695_vm8, %v679_v32, %v682_v36 }
  0x4d   :  { %v703_v48 = vsel %vm695_vm8, %v682_v36, %v685_v38  ;;  %v700_v50 = vsel %vm698_vm11, %v688_v41, 2102212464  ;;  %v704_v51 = vsel %vm698_vm11, %v691_v44, 920167782  ;;  %v707_v52 = vsel %vm695_vm8, %v685_v38, %v688_v41 }
  0x4e   :  { %v368_v49 = vadd.s32 536870912, %v367_v43  ;;  %v701_v53 = vsel %vm697_vm10, %v685_v38, %v700_v50  ;;  %v705_v54 = vsel %vm697_vm10, %v688_v41, %v704_v51  ;;  %v708_v55 = vsel %vm698_vm11, %v694_v45, 1326507024 }
  0x4f   :  { %v911_v56 = vadd.s32 1, %v1349_v19  ;;  %v1641_v57 = vand.u32 31, %v1623_v20  ;;  %v706_v58 = vsel %vm696_vm9, %v703_v48, %v705_v54  ;;  %v709_v59 = vsel %vm697_vm10, %v691_v44, %v708_v55 }
  0x50   :  { %v908_v60 = vand.u32 8388607, %v901_v4  ;;  %v702_v61 = vsel %vm696_vm9, %v699_v47, %v701_v53  ;;  %v710_v62 = vsel %vm696_vm9, %v707_v52, %v709_v59  ;;  %v1653_v7 = vshrl.u32 %v368_v49, 30 }
  0x51   :  { %v1649_v63 = vmul.u32.u64.low %v1621_v18, %v706_v58  ;;  %v1650_v6 = vmul.u32.u64.high %v1621_v18, %v706_v58, %v1649_v63  ;;  %v1656_v8 = vmul.u32.u64.low %v1621_v18, %v710_v62  ;;  %v1657_v9 = vmul.u32.u64.high %v1621_v18, %v710_v62, %v1656_v8 }
  0x52   :  { %vm912_vm12 = vcmp.gt.s32.totalorder %v911_v56, 0  ;;  %v718_v15 = vmul.u32 %v1621_v18, %v702_v61  ;;  %v909_v21 = vor.u32 8388608, %v908_v60  ;;  %v69_v22 = vand.u32 2147483647, %v1566_v0 }
  0x53   :  { %v913_v14 = vsel %vm912_vm12, %v911_v56, 0  ;;  %v721_v19 = vadd.s32 1, %v1650_v6  ;;  %v370_v23 = vshll.u32 %v1653_v7, 30  ;;  %v1664_v24 = vsub.s32 32, %v1641_v57 }
  0x54   :  { %v915_v17 = vand.u32 31, %v913_v14  ;;  %vm720_vm13 = vc.u32 %v1657_v9, %v1649_v63  ;;  %v95_v28 = vshll.u32 %v1521_v35, %v1641_v57  ;;  %v914_v34 = vshrl.u32 %v913_v14, 5 }
  0x55   :  { %v722_v18 = vsel %vm720_vm13, %v721_v19, %v1650_v6  ;;  %v1679_v42 = vsub.s32 %v367_v43, %v370_v23  ;;  %v96_v44 = vshrl.u32 %v1522_v37, %v1664_v24  ;;  %v1689_v43 = vshrl.u32 %v1623_v20, 5 }
  0x56   :  { %v916_v25 = vsub.s32 32, %v915_v17  ;;  %v918_v30 = vshll.u32 %v1518_v29, %v915_v17  ;;  %v921_v27 = vshll.u32 %v1519_v31, %v915_v17  ;;  %v723_v32 = vadd.s32 %v722_v18, %v718_v15 }
  0x57   :  { %v924_v38 = vshll.u32 %v1520_v33, %v915_v17  ;;  %v927_v40 = vshll.u32 %v1521_v35, %v915_v17  ;;  %v930_v47 = vshll.u32 %v1522_v37, %v915_v17  ;;  %vm933_vm14 = vcmp.lt.s32.totalorder %v914_v34, 1 }
  0x58   :  { %v919_v36 = vshrl.u32 %v1519_v31, %v916_v25  ;;  %v922_v39 = vshrl.u32 %v1520_v33, %v916_v25  ;;  %v925_v26 = vshrl.u32 %v1521_v35, %v916_v25  ;;  %v928_v41 = vshrl.u32 %v1522_v37, %v916_v25 }
  0x59   :  { %v724_v45 = vadd.s32 536870912, %v723_v32  ;;  %v931_v51 = vshrl.u32 %v1523_v46, %v916_v25  ;;  %v917_v53 = vshrl.u32 %v1518_v29, %v916_v25  ;;  %v98_v55 = vshll.u32 %v1522_v37, %v1641_v57 }
  0x5a   :  { %v920_v48 = vor.u32 %v919_v36, %v918_v30  ;;  %v923_v49 = vor.u32 %v922_v39, %v921_v27  ;;  %v929_v50 = vor.u32 %v928_v41, %v927_v40  ;;  %v926_v54 = vor.u32 %v925_v26, %v924_v38 }
  0x5b   :  { %v1685_v52 = vshrl.u32 %v724_v45, 30  ;;  %v932_v56 = vor.u32 %v931_v51, %v930_v47  ;;  %vm936_vm15 = vcmp.lt.s32.totalorder %v914_v34, 4  ;;  %v99_v58 = vshrl.u32 %v1523_v46, %v1664_v24 }
  0x5c   :  { %vm935_vm0 = vcmp.lt.s32.totalorder %v914_v34, 3  ;;  %v938_v60 = vsel %vm936_vm15, %v926_v54, 2102212464  ;;  %vm934_vm1 = vcmp.lt.s32.totalorder %v914_v34, 2  ;;  %v941_v61 = vsel %vm933_vm14, %v920_v48, %v923_v49 }
  0x5d   :  { %v726_v59 = vshll.u32 %v1685_v52, 30  ;;  %v942_v62 = vsel %vm936_vm15, %v929_v50, 920167782  ;;  %v949_v20 = vshll.u32 %v909_v21, 8  ;;  %v373_v6 = vsub.s32 0, %v1679_v42 }
  0x5e   :  { %v97_v8 = vor.u32 %v96_v44, %v95_v28  ;;  %v937_v14 = vsel %vm933_vm14, %v917_v53, %v920_v48  ;;  %v939_v46 = vsel %vm935_vm0, %v923_v49, %v938_v60  ;;  %v943_v15 = vsel %vm935_vm0, %v926_v54, %v942_v62 }
  0x5f   :  { %v1700_v37 = vsub.s32 %v723_v32, %v726_v59  ;;  %v945_v17 = vsel %vm933_vm14, %v923_v49, %v926_v54  ;;  %v946_v19 = vsel %vm936_vm15, %v932_v56, 1326507024  ;;  %vm104_vm2 = vcmp.lt.s32.totalorder %v1689_v43, 4 }
  0x60   :  { %v944_v21 = vsel %vm934_vm1, %v941_v61, %v943_v15  ;;  %v86_v25 = vshll.u32 %v1518_v29, %v1641_v57  ;;  %v947_v28 = vsel %vm935_vm0, %v929_v50, %v946_v19  ;;  %v87_v27 = vshrl.u32 %v1519_v31, %v1664_v24 }
  0x61   :  { %v729_v23 = vsub.s32 0, %v1700_v37  ;;  %v1713_v18 = vmul.u32.u64.low %v949_v20, %v944_v21  ;;  %v1714_v30 = vmul.u32.u64.high %v949_v20, %v944_v21, %v1713_v18  ;;  %v1334_v32 = vmin.u32 %v373_v6, %v1679_v42 }
  0x62   :  { %v940_v38 = vsel %vm934_vm1, %v937_v14, %v939_v46  ;;  %v948_v39 = vsel %vm934_vm1, %v945_v17, %v947_v28  ;;  %v89_v41 = vshll.u32 %v1519_v31, %v1641_v57  ;;  %v90_v44 = vshrl.u32 %v1520_v33, %v1664_v24 }
  0x63   :  { %v1342_v36 = vmin.u32 %v729_v23, %v1700_v37  ;;  %v1723_v26 = vmul.u32.u64.low %v949_v20, %v948_v39  ;;  %v1724_v40 = vmul.u32.u64.high %v949_v20, %v948_v39, %v1723_v26  ;;  %v100_v45 = vor.u32 %v99_v58, %v98_v55 }
  0x64   :  { %v110_v47 = vsel %vm104_vm2, %v97_v8, 920167782  ;;  %v92_v49 = vshll.u32 %v1520_v33, %v1641_v57  ;;  %v956_v50 = vmul.u32 %v949_v20, %v940_v38  ;;  %v959_v34 = vadd.s32 1, %v1714_v30 }
  0x65   :  { %v731_v48 = vclz %v1342_v36  ;;  %v76_v51 = vand.u32 8388607, %v69_v22  ;;  %v93_v31 = vshrl.u32 %v1521_v35, %v1664_v24  ;;  %v375_v53 = vclz %v1334_v32 }
  0x66   :  { %v88_v56 = vor.u32 %v87_v27, %v86_v25  ;;  %v91_v55 = vor.u32 %v90_v44, %v89_v41  ;;  %vm958_vm3 = vc.u32 %v1724_v40, %v1713_v18  ;;  %vm101_vm4 = vcmp.lt.s32.totalorder %v1689_v43, 1 }
  0x67   :  { %v1343_v54 = vadd.s32 4294967294, %v731_v48  ;;  %v94_v58 = vor.u32 %v93_v31, %v92_v49  ;;  %vm103_vm5 = vcmp.lt.s32.totalorder %v1689_v43, 3  ;;  %v114_v33 = vsel %vm104_vm2, %v100_v45, 1326507024 }
  0x68   :  { %v960_v57 = vsel %vm958_vm3, %v959_v34, %v1714_v30  ;;  %v85_v35 = vshrl.u32 %v1518_v29, %v1664_v24  ;;  %v77_v60 = vor.u32 8388608, %v76_v51  ;;  %v1335_v62 = vadd.s32 4294967294, %v375_v53 }
  0x69   :  { %vm1344_vm6 = vcmp.lt.s32.totalorder %v1343_v54, 0  ;;  %v961_v59 = vadd.s32 %v960_v57, %v956_v50  ;;  %v106_v61 = vsel %vm104_vm2, %v94_v58, 2102212464  ;;  %vm102_vm7 = vcmp.lt.s32.totalorder %v1689_v43, 2 }
  0x6a   :  { %v109_v20 = vsel %vm101_vm4, %v88_v56, %v91_v55  ;;  %v111_v6 = vsel %vm103_vm5, %v94_v58, %v110_v47  ;;  %v113_v46 = vsel %vm101_vm4, %v91_v55, %v94_v58  ;;  %v734_v29 = vsel %vm1344_vm6, 0, %v1343_v54 }
  0x6b   :  { %v962_v14 = vadd.s32 536870912, %v961_v59  ;;  %v105_v24 = vsel %vm101_vm4, %v85_v35, %v88_v56  ;;  %v107_v15 = vsel %vm103_vm5, %v91_v55, %v106_v61  ;;  %v112_v19 = vsel %vm102_vm7, %v109_v20, %v111_v6 }
  0x6c   :  { %v115_v23 = vsel %vm103_vm5, %v97_v8, %v114_v33  ;;  %v117_v21 = vshll.u32 %v77_v60, 8  ;;  %vm1336_vm8 = vcmp.lt.s32.totalorder %v1335_v62, 0  ;;  %v739_v32 = vsub.s32 4294967266, %v734_v29 }
  0x6d   :  { %v1761_v17 = vshrl.u32 %v962_v14, 30  ;;  %v116_v25 = vsel %vm102_vm7, %v113_v46, %v115_v23  ;;  %v108_v36 = vsel %vm102_vm7, %v105_v24, %v107_v15  ;;  %v378_v26 = vsel %vm1336_vm8, 0, %v1335_v62 }
  0x6e   :  { %v1770_v30 = vmul.u32.u64.low %v117_v21, %v116_v25  ;;  %v1771_v27 = vmul.u32.u64.high %v117_v21, %v116_v25, %v1770_v30  ;;  %v1775_v38 = vmul.u32.u64.low %v117_v21, %v112_v19  ;;  %v1776_v39 = vmul.u32.u64.high %v117_v21, %v112_v19, %v1775_v38 }
  0x6f   :  { %v964_v28 = vshll.u32 %v1761_v17, 30  ;;  %v719_v8 = vadd.s32 %v1649_v63, %v1657_v9  ;;  %v124_v45 = vmul.u32 %v117_v21, %v108_v36  ;;  %v383_v47 = vsub.s32 4294967266, %v378_v26 }
  0x70   :  { %vm126_vm9 = vc.u32 %v1771_v27, %v1775_v38  ;;  %v735_v48 = vsub.s32 32, %v734_v29  ;;  %v740_v49 = vadd.s32 127, %v739_v32  ;;  %v127_v50 = vadd.s32 1, %v1776_v39 }
  0x71   :  { %v965_v41 = vsub.s32 %v961_v59, %v964_v28  ;;  %v363_v51 = vadd.s32 %v1616_v12, %v1613_v11  ;;  %v379_v31 = vsub.s32 32, %v378_v26  ;;  %v384_v56 = vadd.s32 127, %v383_v47 }
  0x72   :  { %v128_v43 = vsel %vm126_vm9, %v127_v50, %v1776_v39  ;;  %v736_v63 = vshll.u32 %v1700_v37, %v734_v29  ;;  %v737_v9 = vshrl.u32 %v719_v8, %v735_v48  ;;  %v741_v55 = vshll.u32 %v740_v49, 23 }
  0x73   :  { %v967_v44 = vsub.s32 0, %v965_v41  ;;  %v129_v54 = vadd.s32 %v128_v43, %v124_v45  ;;  %v380_v57 = vshll.u32 %v1679_v42, %v378_v26  ;;  %v381_v35 = vshrl.u32 %v363_v51, %v379_v31 }
  0x74   :  { %v957_v59 = vadd.s32 %v1713_v18, %v1724_v40  ;;  %v385_v11 = vshll.u32 %v384_v56, 23  ;;  %v738_v12 = vor.u32 %v737_v9, %v736_v63  ;;  %v742_v61 = vor.u32 4788187, %v741_v55 }
  0x75   :  { %v1350_v34 = vmin.u32 %v967_v44, %v965_v41  ;;  %v130_v33 = vadd.s32 536870912, %v129_v54  ;;  %v382_v42 = vor.u32 %v381_v35, %v380_v57  ;;  %v125_v48 = vadd.s32 %v1775_v38, %v1771_v27 }
  0x76   :  { %v386_v15 = vor.u32 4788187, %v385_v11  ;;  %v745_v19 = vcvt.s32.f32 %v738_v12  ;;  %v743_v23 = vand.u32 2147483647, %v742_v61  ;;  %vm665_vm12 = vcmp.lt.s32.totalorder %v1570_v2, 0 }
  0x77   :  { %v969_v53 = vclz %v1350_v34  ;;  %v1789_v60 = vshrl.u32 %v130_v33, 30  ;;  %v389_v32 = vcvt.s32.f32 %v382_v42  ;;  %vm1796_vm13 = vcmp.le.f32.partialorder %v663_v10, 0.7853982 }
  0x78   :  { %v387_v36 = vand.u32 2147483647, %v386_v15  ;;  %v746_v39 = vmul.f32 %v745_v19, %v743_v23  ;;  %vm903_vm14 = vcmp.lt.s32.totalorder %v1585_v13, 0  ;;  %vm309_vm15 = vcmp.lt.s32.totalorder %v1568_v1, 0 }
  0x79   :  { %v1351_v58 = vadd.s32 4294967294, %v969_v53  ;;  %v132_v14 = vshll.u32 %v1789_v60, 30  ;;  %vm1806_vm0 = vcmp.le.f32.partialorder %v901_v4, 0.7853982  ;;  %vm1814_vm1 = vcmp.le.f32.partialorder %v307_v3, 0.7853982 }
  0x7a   :  { %v390_v45 = vmul.f32 %v389_v32, %v387_v36  ;;  %v747_v47 = vxor.u32 2147483648, %v746_v39  ;;  %v987_v35 = vsub.s32 4, %v1761_v17  ;;  %v749_v11 = vsub.s32 4, %v1685_v52 }
  0x7b   :  { %vm1352_vm10 = vcmp.lt.s32.totalorder %v1351_v58, 0  ;;  %v133_v24 = vsub.s32 %v129_v54, %v132_v14  ;;  %vm71_vm2 = vcmp.lt.s32.totalorder %v1566_v0, 0  ;;  %vm70_vm3 = vcmp.le.f32.partialorder %v69_v22, 0.7853982 }
  0x7c   :  { %v972_v62 = vsel %vm1352_vm10, 0, %v1351_v58  ;;  %v391_v53 = vxor.u32 2147483648, %v390_v45  ;;  %v748_v27 = vsel %vm665_vm12, %v747_v47, %v746_v39  ;;  %v393_v19 = vsub.s32 4, %v1653_v7 }
  0x7d   :  { %v973_v20 = vsub.s32 32, %v972_v62  ;;  %v974_v6 = vshll.u32 %v965_v41, %v972_v62  ;;  %v977_v37 = vsub.s32 4294967266, %v972_v62  ;;  %v135_v21 = vsub.s32 0, %v133_v24 }
  0x7e   :  { %v751_v58 = vsel %vm1796_vm13, %v1570_v2, %v748_v27  ;;  %v392_v4 = vsel %vm309_vm15, %v391_v53, %v390_v45  ;;  %v988_v62 = vsel %vm903_vm14, %v987_v35, %v1761_v17 }
  0x7f   :  { %v975_v46 = vshrl.u32 %v957_v59, %v973_v20  ;;  %v978_v29 = vadd.s32 127, %v977_v37  ;;  %v1326_v30 = vmin.u32 %v135_v21, %v133_v24  ;;  %1389 = vcosq.f32 %v751_v58 }
  0x80   :  { %v395_v12 = vsel %vm1814_vm1, %v1568_v1, %v392_v4  ;;  %1391 = vsinq.f32 %v751_v58  ;;  %v155_v20 = vsub.s32 4, %v1789_v60  ;;  %v750_v37 = vsel %vm665_vm12, %v749_v11, %v1685_v52 }
  0x81   :  { %v976_v18 = vor.u32 %v975_v46, %v974_v6  ;;  %v979_v40 = vshll.u32 %v978_v29, 23  ;;  %v137_v41 = vclz %v1326_v30  ;;  %v990_v14 = vsel %vm1806_vm0, 0, %v988_v62 }
  0x82   :  { %v156_v17 = vsel %vm71_vm2, %v155_v20, %v1789_v60  ;;  %v994_v42 = vadd.s32 3, %v990_v14  ;;  %v1848_v23 = vand.u32 3, %v990_v14  ;;  %v394_v60 = vsel %vm309_vm15, %v393_v19, %v1653_v7 }
  0x83   :  { %v980_v25 = vor.u32 4788187, %v979_v40  ;;  %v983_v28 = vcvt.s32.f32 %v976_v18  ;;  %v1327_v44 = vadd.s32 4294967294, %v137_v41  ;;  %v158_v22 = vsel %vm70_vm3, 0, %v156_v17 }
  0x84   :  { %v995_v52 = vand.u32 3, %v994_v42  ;;  %v162_v40 = vadd.s32 3, %v158_v22  ;;  %v396_v7 = vsel %vm1814_vm1, 0, %v394_v60  ;;  %vm1099_vm15 = vcmp.lt.s32.totalorder %v1848_v23, 2 }
  0x85   :  { %v981_v26 = vand.u32 2147483647, %v980_v25  ;;  %vm1328_vm11 = vcmp.lt.s32.totalorder %v1327_v44, 0  ;;  %v504_v62 = vand.u32 3, %v396_v7 }
  0x86   :  { %v140_v49 = vsel %vm1328_vm11, 0, %v1327_v44  ;;  %vm996_vm5 = vcmp.lt.s32.totalorder %v995_v52, 2  ;;  %vm997_vm6 = vcmp.eq.s32.totalorder %v995_v52, 0  ;;  %v163_v39 = vand.u32 3, %v162_v40 }
  0x87   :  { %v984_v8 = vmul.f32 %v983_v28, %v981_v26  ;;  %v141_v34 = vsub.s32 32, %v140_v49  ;;  %v142_v43 = vshll.u32 %v133_v24, %v140_v49  ;;  %v145_v51 = vsub.s32 4294967266, %v140_v49 }
  0x88   :  { %v752_v24 = vsel %vm1796_vm13, 0, %v750_v37  ;;  %v266_v26 = vand.u32 3, %v158_v22  ;;  %vm1000_vm9 = vcmp.eq.s32.totalorder %v995_v52, 2  ;;  %vm164_vm7 = vcmp.lt.s32.totalorder %v163_v39, 2 }
  0x89   :  { %v985_v50 = vxor.u32 2147483648, %v984_v8  ;;  %v143_v38 = vshrl.u32 %v125_v48, %v141_v34  ;;  %v146_v54 = vadd.s32 127, %v145_v51  ;;  %v756_v15 = vadd.s32 3, %v752_v24 }
  0x8a   :  { %v1853_v30 = vand.u32 3, %v752_v24  ;;  %v400_v48 = vadd.s32 3, %v396_v7  ;;  %vm267_vm11 = vcmp.lt.s32.totalorder %v266_v26, 2  ;;  %vm268_vm10 = vcmp.eq.s32.totalorder %v266_v26, 0 }
  0x8b   :  { %v986_v10 = vsel %vm903_vm14, %v985_v50, %v984_v8  ;;  %v144_v63 = vor.u32 %v143_v38, %v142_v43  ;;  %v147_v9 = vshll.u32 %v146_v54, 23  ;;  %v757_v25 = vand.u32 3, %v756_v15 }
  0x8c   :  { %v989_v59 = vsel %vm1806_vm0, %v1585_v13, %v986_v10  ;;  %v1390_v18 = vpop.eup %1389  ;;  %vm861_vm0 = vcmp.lt.s32.totalorder %v1853_v30, 2  ;;  %vm865_vm1 = vcmp.eq.s32.totalorder %v1853_v30, 2  ;;  %vm271_vm8 = vcmp.eq.s32.totalorder %v266_v26, 2 }
  0x8d   :  { %v148_v33 = vor.u32 4788187, %v147_v9  ;;  %v151_v57 = vcvt.s32.f32 %v144_v63  ;;  %1393 = vcosq.f32 %v989_v59  ;;  %v1392_v21 = vpop.eup %1391  ;;  %vm758_vm12 = vcmp.lt.s32.totalorder %v757_v25, 2 }
  0x8e   :  { %1395 = vsinq.f32 %v989_v59  ;;  %vm759_vm13 = vcmp.eq.s32.totalorder %v757_v25, 0  ;;  %vm762_vm14 = vcmp.eq.s32.totalorder %v757_v25, 2  ;;  %v763_v41 = vxor.u32 2147483648, %v1390_v18 }
  0x8f   :  { %v149_v3 = vand.u32 2147483647, %v148_v33  ;;  %1397 = vsinq.f32 %v395_v12  ;;  %v760_v45 = vxor.u32 2147483648, %v1392_v21  ;;  %vm165_vm4 = vcmp.eq.s32.totalorder %v163_v39, 0 }
  0x90   :  { %1399 = vcosq.f32 %v395_v12  ;;  %v764_v51 = vsel %vm762_vm14, %v763_v41, %v1392_v21  ;;  %v401_v10 = vand.u32 3, %v400_v48  ;;  %v867_v4 = vsel %vm865_vm1, %v763_v41, %v1392_v21 }
  0x91   :  { %v152_v61 = vmul.f32 %v151_v57, %v149_v3  ;;  %v761_v38 = vsel %vm759_vm13, %v1390_v18, %v760_v45  ;;  %vm506_vm13 = vcmp.eq.s32.totalorder %v504_v62, 0  ;;  %vm509_vm14 = vcmp.eq.s32.totalorder %v504_v62, 2 }
  0x92   :  { %v765_v59 = vsel %vm758_vm12, %v761_v38, %v764_v51  ;;  %vm402_vm12 = vcmp.lt.s32.totalorder %v401_v10, 2  ;;  %vm505_vm1 = vcmp.lt.s32.totalorder %v504_v62, 2 }
  0x93   :  { %v153_v6 = vxor.u32 2147483648, %v152_v61 }
  0x95   :  { %v154_v46 = vsel %vm71_vm2, %v153_v6, %v152_v61  ;;  %vm862_vm2 = vcmp.eq.s32.totalorder %v1853_v30, 0 }
  0x96   :  { %v157_v29 = vsel %vm70_vm3, %v1566_v0, %v154_v46  ;;  %vm168_vm3 = vcmp.eq.s32.totalorder %v163_v39, 2  ;;  %v864_v58 = vsel %vm862_vm2, %v1390_v18, %v760_v45 }
  0x97   :  { %1401 = vcosq.f32 %v157_v29  ;;  %v868_v37 = vsel %vm861_vm0, %v864_v58, %v867_v4  ;;  %vm399_vm0 = vweird.f32 %v1568_v1 }
  0x98   :  { %1403 = vsinq.f32 %v157_v29 }
  0x9a   :  { %v1394_v28 = vpop.eup %1393 }
  0x9b   :  { %v1396_v32 = vpop.eup %1395  ;;  %v1001_v44 = vxor.u32 2147483648, %v1394_v28 }
  0x9c   :  { %v1858_v36 = vpop.eup %1397  ;;  %v998_v8 = vxor.u32 2147483648, %v1396_v32 }
  0x9d   :  { %v1400_v47 = vpop.eup %1399  ;;  %v404_v49 = vxor.u32 2147483648, %v1858_v36  ;;  %v1002_v27 = vsel %vm1000_vm9, %v1001_v44, %v1396_v32  ;;  %vm2299_vm9 = vcmp.eq.s32.totalorder %v1848_v23, 2 }
  0x9e   :  { %v999_v53 = vsel %vm997_vm6, %v1394_v28, %v998_v8  ;;  %v407_v63 = vxor.u32 2147483648, %v1400_v47  ;;  %vm2296_vm6 = vweird.f32 %v1566_v0  ;;  %v1105_v61 = vsel %vm2299_vm9, %v1001_v44, %v1396_v32 }
  0x9f   :  { %v1003_v35 = vsel %vm996_vm5, %v999_v53, %v1002_v27  ;;  %vm403_vm5 = vcmp.eq.s32.totalorder %v401_v10, 0  ;;  %v508_v42 = vsel %vm506_vm13, %v1400_v47, %v404_v49 }
  0xa0   :  { %v405_v14 = vsel %vm403_vm5, %v1400_v47, %v404_v49  ;;  %v511_v22 = vsel %vm509_vm14, %v407_v63, %v1858_v36 }
  0xa1   :  { %v512_v15 = vsel %vm505_vm1, %v508_v42, %v511_v22 }
  0xa2   :  { %v1933_v1 = vsel %vm399_vm0, nan, %v512_v15 }
  0xa4   :  { %v1402_v50 = vpop.eup %1401 }
  0xa5   :  { %v1404_v34 = vpop.eup %1403  ;;  %v169_v43 = vxor.u32 2147483648, %v1402_v50 }
  0xa6   :  { %v166_v31 = vxor.u32 2147483648, %v1404_v34 }
  0xa7   :  { %v273_v54 = vsel %vm271_vm8, %v169_v43, %v1404_v34  ;;  %v170_v56 = vsel %vm168_vm3, %v169_v43, %v1404_v34  ;;  %vm2298_vm8 = vcmp.eq.s32.totalorder %v1848_v23, 0  ;;  %v557_v23 = vpop.permute.xlu1 %556  ;;  %vm1293_vm3 = vcmask 48168  }
  0xa8   :  { %v270_v9 = vsel %vm268_vm10, %v1402_v50, %v166_v31  ;;  %v167_v55 = vsel %vm165_vm4, %v1402_v50, %v166_v31  ;;  %vm2297_vm4 = vmmov %vm2296_vm6  ;;  %v1102_v12 = vsel %vm2298_vm8, %v1394_v28, %v998_v8  ;;  %vm2300_vm10 = vweird.f32 %v1585_v13 }
  0xa9   :  { %v274_v33 = vsel %vm267_vm11, %v270_v9, %v273_v54  ;;  %v171_v57 = vsel %vm164_vm7, %v167_v55, %v170_v56  ;;  %vm406_vm7 = vcmp.eq.s32.totalorder %v401_v10, 2  ;;  %v1899_v0 = vsel %vm2300_vm10, nan, %v1003_v35  ;;  %vm2302_vm2 = vmmov %vm2300_vm10 }
  0xaa   :  { %v1883_v3 = vsel %vm2296_vm6, nan, %v274_v33  ;;  %v1887_v11 = vsel %vm2297_vm4, nan, %v171_v57  ;;  %vm2301_vm11 = vweird.f32 %v1570_v2  ;;  %v1106_v6 = vsel %vm1099_vm15, %v1102_v12, %v1105_v61 }
  0xab   :  { %277 = vrot.lane.b32.xlu1 %v1883_v3, %s1524_s3  ;;  %282 = vrot.lane.b32.xlu0 %v1887_v11, %s1524_s3  ;;  %v1903_v20 = vsel %vm2301_vm11, nan, %v765_v59  ;;  %v408_v46 = vsel %vm406_vm7, %v407_v63, %v1858_v36  ;;  %v1916_v17 = vsel %vm2302_vm2, nan, %v1106_v6  ;;  %vm2303_vm15 = vmmov %vm2301_vm11  ;;  %v1950_v19 = vsub.f32 0.0, %v1899_v0  ;;  %v1151_v21 = vpop.permute.xlu1 %1150 }
  0xac   :  { %v1920_v29 = vsel %vm2303_vm15, nan, %v868_v37  ;;  %v409_v24 = vsel %vm402_vm12, %v405_v14, %v408_v46  ;;  %v900_v2 = vsub.f32 0.0, %v1903_v20  ;;  %vm1306_vm6 = vcmask 0  }
  0xad   :  { %v1928_v13 = vsel %vm399_vm0, nan, %v409_v24 }
  0xae   :  { %v1962_v52 = vsub.f32 0.0, %v1928_v13  ;;  %v1153_v25 = vmul.f32 %v1151_v21, %v900_v2 }
  0xaf   :  { %1114 = vrot.lane.b32.xlu1 %v1899_v0, %s1524_s3  ;;  %876 = vrot.lane.b32.xlu0 %v1903_v20, %s1524_s3 }
  0xb3   :  { %1109 = vrot.lane.b32.xlu1 %v1916_v17, %s1524_s3  ;;  %871 = vrot.lane.b32.xlu0 %v1920_v29, %s1524_s3 }
  0xb7   :  { %551 = vrot.lane.b32.xlu1 %v1576_v5, %s1525_s7  ;;  %520 = vrot.lane.b32.xlu0 %v1928_v13, %s1524_s3 }
  0xbb   :  { %1145 = vrot.lane.b32.xlu1 %v1589_v16, %s1525_s7  ;;  %515 = vrot.lane.b32.xlu0 %v1933_v1, %s1524_s3 }
  0xbf   :  { %290 = vrot.lane.b32.xlu1 %v1883_v3, %s1517_s2  ;;  %547 = vrot.lane.b32.xlu0 %v1576_v5, %s1526_s8  ;;  %v1180_v5 = vmul.f32 %v1950_v19, %v900_v2 }
  0xc3   :  { %884 = vrot.lane.b32.xlu1 %v1920_v29, %s1517_s2  ;;  %1141 = vrot.lane.b32.xlu0 %v1589_v16, %s1526_s8  ;;  %v306_v16 = vsub.f32 0.0, %v1887_v11 }
  0xc5   :  { %v586_v18 = vmul.f32 %v1962_v52, %v306_v16  ;;  %v559_v40 = vmul.f32 %v557_v23, %v306_v16 }
  0xc7   :  { %528 = vrot.lane.b32.xlu1 %v1933_v1, %s1517_s2  ;;  %286 = vrot.lane.b32.xlu0 %v1887_v11, %s1517_s2 }
  0xcb   :  { %1122 = vrot.lane.b32.xlu1 %v1916_v17, %s1517_s2  ;;  %880 = vrot.lane.b32.xlu0 %v1903_v20, %s1517_s2 }
  0xcf   :  { %1182 = vrot.lane.b32.xlu1 %v1180_v5, %s1524_s3  ;;  %524 = vrot.lane.b32.xlu0 %v1928_v13, %s1517_s2 }
  0xd3   :  { %1118 = vrot.lane.b32.xlu0 %v1899_v0, %s1517_s2 }
  0xd7   :  { %588 = vrot.lane.b32.xlu0 %v586_v18, %s1524_s3 }
  0xdb   :  { %561 = vrot.lane.b32.xlu0 %v559_v40, %s1524_s3 }
  0xdf   :  { %1155 = vrot.lane.b32.xlu0 %v1153_v25, %s1524_s3 }
 0x11d   :  { %v278_v60 = vpop.permute.xlu1 %277  ;;  %v283_v28 = vpop.permute.xlu0 %282 }
 0x11e   :  { %v1971_v30 = vmul.f32 %v278_v60, %v1883_v3  ;;  %v1974_v32 = vmul.f32 %v283_v28, %v1883_v3  ;;  %v2019_v63 = vmul.f32 %v278_v60, %v1887_v11  ;;  %v299_v14 = vmul.f32 %v283_v28, %v1887_v11 }
 0x120   :  { %v568_v36 = vmul.f32 %v557_v23, %v1974_v32  ;;  %v577_v39 = vmul.f32 %v557_v23, %v1971_v30  ;;  %v613_v15 = vmul.f32 %v1962_v52, %v1974_v32 }
 0x121   :  { %v1115_v26 = vpop.permute.xlu1 %1114  ;;  %v877_v7 = vpop.permute.xlu0 %876 }
 0x122   :  { %v1979_v41 = vmul.f32 %v877_v7, %v1920_v29  ;;  %570 = vrot.lane.b32.xlu1 %v568_v36, %s1524_s3  ;;  %579 = vrot.lane.b32.xlu0 %v577_v39, %s1524_s3  ;;  %v1998_v34 = vmul.f32 %v1115_v26, %v1916_v17  ;;  %v2054_v24 = vmul.f32 %v1115_v26, %v1899_v0 }
 0x124   :  { %v1162_v8 = vmul.f32 %v1151_v21, %v1979_v41  ;;  %v1189_v54 = vmul.f32 %v1998_v34, %v900_v2  ;;  %v1207_v46 = vmul.f32 %v1950_v19, %v1979_v41  ;;  %v1216_v23 = vmul.f32 %v1998_v34, %v1979_v41 }
 0x125   :  { %v1110_v44 = vpop.permute.xlu1 %1109  ;;  %v872_v45 = vpop.permute.xlu0 %871 }
 0x126   :  { %v1985_v47 = vmul.f32 %v1110_v44, %v1916_v17  ;;  %v1988_v48 = vmul.f32 %v1110_v44, %v1899_v0  ;;  %v1991_v49 = vmul.f32 %v872_v45, %v1920_v29  ;;  %v1994_v50 = vmul.f32 %v872_v45, %v1903_v20  ;;  %1164 = vrot.lane.b32.xlu1 %v1162_v8, %s1524_s3 }
 0x128   :  { %v1171_v43 = vmul.f32 %v1151_v21, %v1991_v49  ;;  %v2003_v51 = vmul.f32 %v1985_v47, %v1991_v49  ;;  %v1178_v27 = vmul.f32 %v1988_v48, %v1994_v50  ;;  %v1198_v33 = vmul.f32 %v1985_v47, %v900_v2 }
 0x129   :  { %v2005_v31 = vpop.permute.xlu1 %551  ;;  %v521_v53 = vpop.permute.xlu0 %520  ;;  %v2062_v2 = vmul.f32 %v1962_v52, %v1971_v30  ;;  %v1225_v18 = vmul.f32 %v1985_v47, %v1979_v41  ;;  %v1234_v40 = vmul.f32 %v1950_v19, %v1991_v49  ;;  %v2082_v60 = vmul.f32 %v1998_v34, %v1991_v49 }
 0x12a   :  { %v2010_v38 = vmul.f32 %v521_v53, %v1933_v1  ;;  %1173 = vrot.lane.b32.xlu1 %v1171_v43, %s1524_s3  ;;  %v2015_v56 = vadd.f32 %v1178_v27, %v2003_v51  ;;  %v554_v62 = vmul.f32 %v2005_v31, %v2019_v63  ;;  %v537_v21 = vmul.f32 %v521_v53, %v1928_v13 }
 0x12c   :  { %v595_v10 = vmul.f32 %v2010_v38, %v306_v16  ;;  %v622_v36 = vmul.f32 %v2010_v38, %v1974_v32  ;;  %v2091_v39 = vmul.f32 %v2010_v38, %v1971_v30 }
 0x12d   :  { %v2021_v9 = vpop.permute.xlu1 %1145  ;;  %v516_v55 = vpop.permute.xlu0 %515 }
 0x12e   :  { %v2024_v58 = vmul.f32 %v516_v55, %v1933_v1  ;;  %v2027_v4 = vmul.f32 %v516_v55, %v1928_v13  ;;  %1191 = vrot.lane.b32.xlu1 %v1189_v54, %s1524_s3  ;;  %597 = vrot.lane.b32.xlu0 %v595_v10, %s1524_s3  ;;  %v1148_v52 = vmul.f32 %v2021_v9, %v1994_v50 }
 0x130   :  { %v604_v57 = vmul.f32 %v2024_v58, %v306_v16  ;;  %v2035_v35 = vmul.f32 %v2024_v58, %v1971_v30  ;;  %v584_v59 = vmul.f32 %v2027_v4, %v2019_v63  ;;  %v893_v16 = vmul.f32 %v877_v7, %v1903_v20 }
 0x131   :  { %v291_v12 = vpop.permute.xlu1 %290  ;;  %v2039_v61 = vpop.permute.xlu0 %547  ;;  %v631_v19 = vmul.f32 %v2024_v58, %v1974_v32 }
 0x132   :  { %1200 = vrot.lane.b32.xlu1 %v1198_v33, %s1524_s3  ;;  %v550_v6 = vmul.f32 %v2039_v61, %v1971_v30  ;;  %606 = vrot.lane.b32.xlu0 %v604_v57, %s1524_s3  ;;  %v2048_v37 = vadd.f32 %v584_v59, %v2035_v35  ;;  %v293_v28 = vmul.f32 %v291_v12, %v1887_v11 }
 0x133   :  { %v295_v26 = vmul.f32 %v291_v12, %v1974_v32  ;;  %v301_v7 = vmul.f32 %v291_v12, %v1883_v3  ;;  %v303_v8 = vmul.f32 %v299_v14, %v291_v12 }
 0x134   :  { %v2064_v5 = vadd.f32 %v554_v62, %v550_v6 }
 0x135   :  { %v885_v42 = vpop.permute.xlu1 %884  ;;  %v2056_v22 = vpop.permute.xlu0 %1141 }
 0x136   :  { %1209 = vrot.lane.b32.xlu1 %v1207_v46, %s1524_s3  ;;  %v1144_v25 = vmul.f32 %v2056_v22, %v1991_v49  ;;  %615 = vrot.lane.b32.xlu0 %v613_v15, %s1524_s3  ;;  %v887_v53 = vmul.f32 %v885_v42, %v1903_v20  ;;  %v889_v27 = vmul.f32 %v885_v42, %v1979_v41 }
 0x137   :  { %v895_v54 = vmul.f32 %v885_v42, %v1920_v29  ;;  %v897_v10 = vmul.f32 %v893_v16, %v885_v42 }
 0x138   :  { %v2095_v43 = vadd.f32 %v1148_v52, %v1144_v25 }
 0x139   :  { %v529_v44 = vpop.permute.xlu1 %528  ;;  %v287_v45 = vpop.permute.xlu0 %286 }
 0x13a   :  { %1218 = vrot.lane.b32.xlu1 %v1216_v23, %s1524_s3  ;;  %v289_v55 = vmul.f32 %v287_v45, %v1974_v32  ;;  %v296_v33 = vmul.f32 %v287_v45, %v1887_v11  ;;  %v300_v57 = vmul.f32 %v299_v14, %v287_v45  ;;  %v304_v59 = vmul.f32 %v287_v45, %v1883_v3 }
 0x13b   :  { %624 = vrot.lane.b32.xlu0 %v622_v36, %s1524_s3  ;;  %v531_v12 = vmul.f32 %v529_v44, %v1928_v13  ;;  %v533_v62 = vmul.f32 %v529_v44, %v2010_v38  ;;  %v539_v6 = vmul.f32 %v529_v44, %v1933_v1  ;;  %v541_v46 = vmul.f32 %v537_v21, %v529_v44 }
 0x13c   :  { %v2108_v15 = vsub.f32 %v289_v55, %v293_v28  ;;  %v2110_v42 = vadd.f32 %v296_v33, %v295_v26  ;;  %v2112_v23 = vadd.f32 %v301_v7, %v300_v57  ;;  %v2114_v32 = vsub.f32 %v303_v8, %v304_v59 }
 0x13d   :  { %v1123_v11 = vpop.permute.xlu1 %1122  ;;  %v881_v14 = vpop.permute.xlu0 %880 }
 0x13e   :  { %v1125_v3 = vmul.f32 %v1123_v11, %v1899_v0  ;;  %v1127_v52 = vmul.f32 %v1123_v11, %v1998_v34  ;;  %v1133_v25 = vmul.f32 %v1123_v11, %v1916_v17  ;;  %v1135_v36 = vmul.f32 %v2054_v24, %v1123_v11  ;;  %1227 = vrot.lane.b32.xlu1 %v1225_v18, %s1524_s3 }
 0x13f   :  { %v883_v28 = vmul.f32 %v881_v14, %v1979_v41  ;;  %v890_v26 = vmul.f32 %v881_v14, %v1903_v20  ;;  %v894_v7 = vmul.f32 %v893_v16, %v881_v14  ;;  %v898_v8 = vmul.f32 %v881_v14, %v1920_v29  ;;  %633 = vrot.lane.b32.xlu0 %v631_v19, %s1524_s3 }
 0x140   :  { %v565_v44 = vmul.f32 %v2039_v61, %v2108_v15  ;;  %v566_v45 = vmul.f32 %v2005_v31, %v2112_v23  ;;  %v574_v55 = vmul.f32 %v2039_v61, %v2110_v42  ;;  %v575_v18 = vmul.f32 %v2005_v31, %v2114_v32 }
 0x141   :  { %v2133_v41 = vsub.f32 %v883_v28, %v887_v53  ;;  %v2135_v20 = vadd.f32 %v890_v26, %v889_v27  ;;  %v2137_v16 = vadd.f32 %v895_v54, %v894_v7  ;;  %v2139_v29 = vsub.f32 %v897_v10, %v898_v8  ;;  %v1183_v19 = vpop.permute.xlu1 %1182  ;;  %v525_v33 = vpop.permute.xlu0 %524 }
 0x142   :  { %v1185_v57 = vadd.f32 %v1183_v19, %v2015_v56  ;;  %v527_v59 = vmul.f32 %v525_v33, %v2010_v38  ;;  %v534_v11 = vmul.f32 %v525_v33, %v1928_v13  ;;  %v538_v61 = vmul.f32 %v537_v21, %v525_v33  ;;  %1236 = vrot.lane.b32.xlu1 %v1234_v40, %s1524_s3 }
 0x143   :  { %v542_v31 = vmul.f32 %v525_v33, %v1933_v1  ;;  %642 = vrot.lane.b32.xlu0 %v2062_v2, %s1524_s3  ;;  %v2148_v53 = vadd.f32 %v566_v45, %v565_v44  ;;  %v2150_v27 = vadd.f32 %v575_v18, %v574_v55  ;;  %v1159_v54 = vmul.f32 %v2056_v22, %v2133_v41 }
 0x144   :  { %v2154_v56 = vsub.f32 %v527_v59, %v531_v12  ;;  %v2156_v38 = vadd.f32 %v534_v11, %v533_v62  ;;  %v2158_v13 = vadd.f32 %v539_v6, %v538_v61  ;;  %v1160_v40 = vmul.f32 %v2021_v9, %v2137_v16 }
 0x145   :  { %v2162_v1 = vsub.f32 %v541_v46, %v542_v31  ;;  %v1119_v21 = vpop.permute.xlu0 %1118  ;;  %v1168_v2 = vmul.f32 %v2056_v22, %v2135_v20  ;;  %v1169_v10 = vmul.f32 %v2021_v9, %v2139_v29  ;;  %v1204_v12 = vmul.f32 %v1985_v47, %v2133_v41 }
 0x146   :  { %v1121_v62 = vmul.f32 %v1119_v21, %v1998_v34  ;;  %v1128_v6 = vmul.f32 %v1119_v21, %v1899_v0  ;;  %v1132_v14 = vmul.f32 %v2054_v24, %v1119_v21  ;;  %v1136_v28 = vmul.f32 %v1119_v21, %v1916_v17  ;;  %1245 = vrot.lane.b32.xlu1 %v2082_v60, %s1524_s3 }
 0x147   :  { %651 = vrot.lane.b32.xlu0 %v2091_v39, %s1524_s3  ;;  %v2178_v22 = vadd.f32 %v1160_v40, %v1159_v54  ;;  %v2180_v9 = vadd.f32 %v1169_v10, %v1168_v2  ;;  %v592_v46 = vmul.f32 %v2154_v56, %v1971_v30  ;;  %v593_v0 = vmul.f32 %v2158_v13, %v2019_v63 }
 0x148   :  { %v1126_v34 = vsub.f32 %v1121_v62, %v1125_v3  ;;  %v1129_v24 = vadd.f32 %v1128_v6, %v1127_v52  ;;  %v1134_v26 = vadd.f32 %v1133_v25, %v1132_v14  ;;  %v1137_v17 = vsub.f32 %v1135_v36, %v1136_v28 }
 0x149   :  { %v589_v7 = vpop.permute.xlu0 %588  ;;  %v2186_v8 = vadd.f32 %v593_v0, %v592_v46  ;;  %v601_v60 = vmul.f32 %v2156_v38, %v1971_v30  ;;  %v602_v39 = vmul.f32 %v2162_v1, %v2019_v63  ;;  %v1205_v44 = vmul.f32 %v1988_v48, %v2137_v16 }
 0x14a   :  { %v591_v45 = vadd.f32 %v589_v7, %v2048_v37  ;;  %1253 = vrot.lane.b32.xlu1 %v2003_v51, %s1524_s3  ;;  %v1186_v3 = vmul.f32 %v1126_v34, %v1991_v49  ;;  %v1187_v52 = vmul.f32 %v1134_v26, %v1994_v50  ;;  %v1195_v25 = vmul.f32 %v1129_v24, %v1991_v49 }
 0x14b   :  { %659 = vrot.lane.b32.xlu0 %v2035_v35, %s1524_s3  ;;  %v1196_v30 = vmul.f32 %v1137_v17, %v1994_v50  ;;  %v2203_v63 = vadd.f32 %v602_v39, %v601_v60  ;;  %v2205_v36 = vadd.f32 %v1205_v44, %v1204_v12  ;;  %v611_v37 = vmul.f32 %v2027_v4, %v2112_v23 }
 0x14c   :  { %v1266_v55 = vsub.f32 %v591_v45, %v1185_v57  ;;  %v1188_v51 = vadd.f32 %v1187_v52, %v1186_v3  ;;  %v610_v18 = vmul.f32 %v2024_v58, %v2108_v15  ;;  %v1213_v19 = vmul.f32 %v1126_v34, %v2133_v41 }
 0x14d   :  { %v562_v49 = vpop.permute.xlu0 %561  ;;  %v1197_v33 = vadd.f32 %v1196_v30, %v1195_v25  ;;  %v1214_v35 = vmul.f32 %v1134_v26, %v2137_v16  ;;  %v620_v50 = vmul.f32 %v2158_v13, %v2112_v23  ;;  %v619_v59 = vmul.f32 %v2154_v56, %v2108_v15 }
 0x14e   :  { %v564_v11 = vadd.f32 %v562_v49, %v2064_v5  ;;  %v2218_v61 = vadd.f32 %v611_v37, %v610_v18  ;;  %v1222_v57 = vmul.f32 %v1129_v24, %v2133_v41  ;;  %v1223_v40 = vmul.f32 %v1137_v17, %v2137_v16 }
 0x14f   :  { %v2221_v31 = vadd.f32 %v1214_v35, %v1213_v19  ;;  %v2223_v54 = vadd.f32 %v620_v50, %v619_v59  ;;  %v629_v21 = vmul.f32 %v2162_v1, %v2112_v23  ;;  %v628_v2 = vmul.f32 %v2156_v38, %v2108_v15 }
 0x150   :  { %v1231_v10 = vmul.f32 %v1985_v47, %v2135_v20  ;;  %v1232_v5 = vmul.f32 %v1988_v48, %v2139_v29  ;;  %v637_v41 = vmul.f32 %v2024_v58, %v2110_v42  ;;  %v2236_v62 = vadd.f32 %v1223_v40, %v1222_v57 }
 0x151   :  { %v1156_v12 = vpop.permute.xlu0 %1155  ;;  %v638_v16 = vmul.f32 %v2027_v4, %v2114_v32  ;;  %v1240_v23 = vmul.f32 %v1126_v34, %v2135_v20  ;;  %v1241_v6 = vmul.f32 %v1134_v26, %v2139_v29  ;;  %v630_v14 = vadd.f32 %v629_v21, %v628_v2 }
 0x152   :  { %v1158_v15 = vadd.f32 %v1156_v12, %v2095_v43  ;;  %v2243_v47 = vadd.f32 %v1232_v5, %v1231_v10  ;;  %v646_v48 = vmul.f32 %v2154_v56, %v2110_v42  ;;  %v647_v46 = vmul.f32 %v2158_v13, %v2114_v32 }
 0x153   :  { %v2247_v28 = vadd.f32 %v638_v16, %v637_v41  ;;  %v2249_v58 = vadd.f32 %v1241_v6, %v1240_v23  ;;  %v1249_v4 = vmul.f32 %v1129_v24, %v2135_v20  ;;  %v1250_v34 = vmul.f32 %v1137_v17, %v2139_v29 }
 0x154   :  { %v1257_v0 = vsub.f32 %v564_v11, %v1158_v15  ;;  %v655_v43 = vmul.f32 %v2156_v38, %v2110_v42  ;;  %v656_v26 = vmul.f32 %v2162_v1, %v2114_v32  ;;  %v2259_v7 = vadd.f32 %v647_v46, %v646_v48 }
 0x155   :  { %v2261_v56 = vadd.f32 %v1250_v34, %v1249_v4 }
 0x156   :  { %v2263_v60 = vadd.f32 %v656_v26, %v655_v43  ;;  %v1258_v45 = vmul.f32 %v1257_v0, %v1257_v0 }
 0x194   :  { %v571_v39 = vpop.permute.xlu1 %570  ;;  %v580_v24 = vpop.permute.xlu0 %579 }
 0x195   :  { %v573_v13 = vadd.f32 %v571_v39, %v2148_v53  ;;  %v582_v42 = vadd.f32 %v580_v24, %v2150_v27  ;;  %v1267_v53 = vmul.f32 %v1266_v55, %v1266_v55 }
 0x198   :  { %v1165_v44 = vpop.permute.xlu1 %1164 }
 0x199   :  { %v1167_v20 = vadd.f32 %v1165_v44, %v2178_v22 }
 0x19b   :  { %v1260_v29 = vsub.f32 %v573_v13, %v1167_v20 }
 0x19c   :  { %v1174_v17 = vpop.permute.xlu1 %1173 }
 0x19d   :  { %v1261_v38 = vmul.f32 %v1260_v29, %v1260_v29  ;;  %v1176_v32 = vadd.f32 %v1174_v17, %v2180_v9 }
 0x19f   :  { %v1262_v1 = vadd.f32 %v1261_v38, %v1258_v45  ;;  %v1263_v3 = vsub.f32 %v582_v42, %v1176_v32 }
 0x1a0   :  { %v1192_v52 = vpop.permute.xlu1 %1191  ;;  %v598_v25 = vpop.permute.xlu0 %597 }
 0x1a1   :  { %v1264_v30 = vmul.f32 %v1263_v3, %v1263_v3  ;;  %v1194_v37 = vadd.f32 %v1192_v52, %v1188_v51  ;;  %v600_v18 = vadd.f32 %v598_v25, %v2186_v8 }
 0x1a3   :  { %v1265_v19 = vadd.f32 %v1264_v30, %v1262_v1  ;;  %v1269_v22 = vsub.f32 %v600_v18, %v1194_v37 }
 0x1a4   :  { %v1201_v49 = vpop.permute.xlu1 %1200  ;;  %v607_v11 = vpop.permute.xlu0 %606 }
 0x1a5   :  { %v1268_v35 = vadd.f32 %v1267_v53, %v1265_v19  ;;  %v1270_v50 = vmul.f32 %v1269_v22, %v1269_v22  ;;  %v1203_v59 = vadd.f32 %v1201_v49, %v1197_v33  ;;  %v609_v27 = vadd.f32 %v607_v11, %v2203_v63 }
 0x1a7   :  { %v1271_v57 = vadd.f32 %v1270_v50, %v1268_v35  ;;  %v1272_v9 = vsub.f32 %v609_v27, %v1203_v59 }
 0x1a8   :  { %v1210_v40 = vpop.permute.xlu1 %1209  ;;  %v616_v2 = vpop.permute.xlu0 %615 }
 0x1a9   :  { %v1212_v21 = vadd.f32 %v1210_v40, %v2205_v36  ;;  %v1273_v10 = vmul.f32 %v1272_v9, %v1272_v9  ;;  %v618_v51 = vadd.f32 %v616_v2, %v2218_v61 }
 0x1ab   :  { %v1274_v8 = vadd.f32 %v1273_v10, %v1271_v57  ;;  %v1275_v55 = vsub.f32 %v618_v51, %v1212_v21 }
 0x1ac   :  { %v1219_v5 = vpop.permute.xlu1 %1218 }
 0x1ad   :  { %v1221_v41 = vadd.f32 %v1219_v5, %v2221_v31  ;;  %v625_v12 = vpop.permute.xlu0 %624  ;;  %v1276_v16 = vmul.f32 %v1275_v55, %v1275_v55 }
 0x1ae   :  { %v627_v33 = vadd.f32 %v625_v12, %v2223_v54 }
 0x1af   :  { %v1277_v23 = vadd.f32 %v1276_v16, %v1274_v8 }
 0x1b0   :  { %v1278_v63 = vsub.f32 %v627_v33, %v1221_v41  ;;  %v1228_v6 = vpop.permute.xlu1 %1227 }
 0x1b1   :  { %v1230_v15 = vadd.f32 %v1228_v6, %v2236_v62  ;;  %v634_v48 = vpop.permute.xlu0 %633 }
 0x1b2   :  { %v1279_v36 = vmul.f32 %v1278_v63, %v1278_v63  ;;  %v636_v46 = vadd.f32 %v634_v48, %v630_v14 }
 0x1b4   :  { %v1280_v4 = vadd.f32 %v1279_v36, %v1277_v23  ;;  %v1281_v0 = vsub.f32 %v636_v46, %v1230_v15  ;;  %v1237_v61 = vpop.permute.xlu1 %1236 }
 0x1b5   :  { %v1239_v34 = vadd.f32 %v1237_v61, %v2243_v47  ;;  %v643_v43 = vpop.permute.xlu0 %642 }
 0x1b6   :  { %v1282_v26 = vmul.f32 %v1281_v0, %v1281_v0  ;;  %v645_v31 = vadd.f32 %v643_v43, %v2247_v28 }
 0x1b8   :  { %v1283_v39 = vadd.f32 %v1282_v26, %v1280_v4  ;;  %v1284_v44 = vsub.f32 %v645_v31, %v1239_v34  ;;  %v1246_v54 = vpop.permute.xlu1 %1245 }
 0x1b9   :  { %v1248_v13 = vadd.f32 %v1246_v54, %v2249_v58  ;;  %v652_v20 = vpop.permute.xlu0 %651 }
 0x1ba   :  { %v1285_v24 = vmul.f32 %v1284_v44, %v1284_v44  ;;  %v654_v62 = vadd.f32 %v652_v20, %v2259_v7 }
 0x1bc   :  { %v1286_v29 = vadd.f32 %v1285_v24, %v1283_v39  ;;  %v1287_v14 = vsub.f32 %v654_v62, %v1248_v13  ;;  %v1254_v17 = vpop.permute.xlu1 %1253 }
 0x1bd   :  { %v1256_v45 = vadd.f32 %v1254_v17, %v2261_v56  ;;  %v660_v42 = vpop.permute.xlu0 %659 }
 0x1be   :  { %v1288_v47 = vmul.f32 %v1287_v14, %v1287_v14  ;;  %v662_v38 = vadd.f32 %v660_v42, %v2263_v60 }
 0x1c0   :  { %v1289_v32 = vadd.f32 %v1288_v47, %v1286_v29  ;;  %v1290_v28 = vsub.f32 %v662_v38, %v1256_v45 }
 0x1c2   :  { %v1291_v1 = vmul.f32 %v1290_v28, %v1290_v28 }
 0x1c4   :  { %v1292_v3 = vadd.f32 %v1291_v1, %v1289_v32 }
 0x1c6   :  { %v1294_v52 = vsel %vm1293_vm3, %v1292_v3, 0.0 }
 0x1c7   :  { %v1295_v58 = vrot.slane %v1294_v52, 4 }
 0x1c9   :  { %v1296_v25 = vadd.f32 %v1295_v58, %v1294_v52 }
 0x1cb   :  { %v1297_v30 = vrot.slane %v1296_v25, 2 }
 0x1cd   :  { %v1298_v37 = vadd.f32 %v1297_v30, %v1296_v25 }
 0x1cf   :  { %v1299_v7 = vrot.slane %v1298_v37, 1 }
 0x1d1   :  { %v1300_v18 = vadd.f32 %v1299_v7, %v1298_v37 }
 0x1d3   :  { %v1301_v53 = vmul.f32 0.010416667, %v1300_v18 }
 0x1d5   :  { %1303 = vrot.lane.b32.xlu0 %v1301_v53, %s1527_s9 }
 0x247   :  { %v1304_v56 = vpop.permute.xlu0 %1303 }
 0x248   :  { %1307 = vst.msk [vmem:[#allocation10] sm:$0x1] %vm1306_vm6, %v1304_v56 }
 0x249   :  { %1496 = shalt.err (!%p1493_p10)
}
 0x24a   :  { %1317 = dma.vmem_to_hbm [thread:$0]  %s1315_s11, 16, %s2289_s4, [#allocation4]  }
 0x24b   :  { %1511 = dma.done.wait [#allocation4], 16  }
 0x24c   :  { %1512 = vsyncadd [#allocation4], 4294967280 }
 0x24d   :  { %1321 = vsyncpa [#allocation3], 1 }
 0x24e   :  { %1322 = vsyncpa [#allocation6], 1 }
 0x24f   :  { %1323 = vsyncpa [#allocation9], 1 }
 0x250   :  { %1324 = vsyncpa [#allocation4], 1 }

</bundles_post_ra>
